<compile_context>
chip_gen: v5e
topology: v5e:2x2
jax: 0.10.0
libtpu: 0.0.40
codegen_flags: <defaults>
</compile_context>

<pallas_src>
import jax
import jax.numpy as jnp
from jax import lax
from jax.experimental import pallas as pl
from jax.experimental.pallas import tpu as pltpu


def _round_up(x, m):
    return ((x + m - 1) // m) * m


def _tpu_generation_config():
    """Pick tile caps / VMEM limits per TPU generation (conservative fallback)."""
    kind = ""
    try:
        dev = jax.devices()[0]
        if dev.platform == "tpu":
            kind = dev.device_kind.lower()
    except Exception:
        pass
    if "v7" in kind or "7x" in kind:
        # 64 MiB VMEM per TensorCore, 2 TensorCores/chip.
        return dict(tm_max=1024, tn_max=1024, tk_max=512,
                    vmem_limit_bytes=44 * 1024 * 1024,
                    input_buffers=2, two_tensorcores=True)
    if "v6" in kind:
        # 128 MiB VMEM; (1024,1024,1024) f32 double-buffered ~ 28 MiB.
        return dict(tm_max=1024, tn_max=1024, tk_max=1024,
                    vmem_limit_bytes=64 * 1024 * 1024,
                    input_buffers=2, two_tensorcores=False)
    if "v5" in kind and ("lite" in kind or "v5e" in kind):
        # Lowest HBM BW: keep tiles modest, buffer inputs 3-deep.
        return dict(tm_max=512, tn_max=512, tk_max=512,
                    vmem_limit_bytes=32 * 1024 * 1024,
                    input_buffers=3, two_tensorcores=False)
    # Unknown generation: conservative defaults.
    return dict(tm_max=512, tn_max=512, tk_max=512,
                vmem_limit_bytes=32 * 1024 * 1024,
                input_buffers=2, two_tensorcores=False)


def make_fdg_feature_generator(weight, bias, *, operand_dtype=jnp.float32,
                               config_overrides=None):
    """One-time parameter prep -> returns a jitted forward(x) closure.

    Args:
      weight: (F_out, F_in) -- PyTorch nn.Linear convention.
      bias:   (F_out,)
      operand_dtype: jnp.float32 (exact, default) or jnp.bfloat16 (faster MXU
        path on v6e/v7x, halves weight HBM bytes; f32 accumulation kept).
    """
    n, k = weight.shape
    assert bias.shape == (n,), bias.shape

    cfg = dict(_tpu_generation_config())
    if config_overrides:
        cfg.update(config_overrides)

    # (8,128)-aligned N/K tiles, capped per generation.
    tn = min(cfg["tn_max"], _round_up(n, 128))
    tk = min(cfg["tk_max"], _round_up(k, 128))
    n_p = _round_up(n, tn)
    k_p = _round_up(k, tk)

    # --- One-time static parameter prep (runs eagerly, NOT per call) -------
    # Transpose to (F_in, F_out) so the kernel contracts (1,0): keeps the MXU
    # path pure (no per-K-step weight-tile transpose through the XLU).
    w_t = jnp.asarray(weight, jnp.float32).T                 # (K, N)
    if (k_p, n_p) != (k, n):
        w_t = jnp.pad(w_t, ((0, k_p - k), (0, n_p - n)))
    w_t = w_t.astype(operand_dtype)
    b_row = jnp.asarray(bias, jnp.float32)
    if n_p != n:
        b_row = jnp.pad(b_row, (0, n_p - n))
    b_row = b_row.reshape(1, n_p)

    # f32 operands: full-precision MXU contraction (matches PyTorch fp32).
    precision = lax.Precision.HIGHEST if operand_dtype == jnp.float32 else None
    w_itemsize = jnp.dtype(operand_dtype).itemsize
    input_buffers = cfg["input_buffers"]

    def kernel(x_ref, w_ref, b_ref, o_ref, acc_ref):
        kk = pl.program_id(2)

        @pl.when(kk == 0)
        def _init():
            # Fold the bias into the accumulator init (saves a VPU pass at
            # finalize). Bias block index is constant over k -> no refetch.
            acc_ref[...] = jnp.broadcast_to(b_ref[...], acc_ref.shape)

        a = x_ref[...]
        if a.dtype != w_ref.dtype:            # optional bf16 MXU path
            a = a.astype(w_ref.dtype)
        acc_ref[...] += jnp.dot(a, w_ref[...],
                                preferred_element_type=jnp.float32,
                                precision=precision)

        @pl.when(kk == pl.num_programs(2) - 1)
        def _finalize():
            o_ref[...] = acc_ref[...].astype(o_ref.dtype)

    def _in_spec(shape, imap):
        # Deeper input buffering on v5e to hide exposed DMA on the K loop.
        if input_buffers != 2:
            try:
                return pl.BlockSpec(shape, imap,
                                    pipeline_mode=pl.Buffered(input_buffers))
            except Exception:
                pass  # older jax without pipeline_mode -> default double-buffer
        return pl.BlockSpec(shape, imap)

    def forward(x):
        if x.ndim > 2:
            x = x.reshape(x.shape[0], -1)
        m, kx = x.shape
        assert kx == k, (kx, k)
        x = x.astype(jnp.float32)

        tm = min(cfg["tm_max"], _round_up(m, 8))
        m_p = _round_up(m, tm)
        if (m_p, k_p) != (m, kx):
            x = jnp.pad(x, ((0, m_p - m), (0, k_p - kx)))   # exact for matmul

        grid_m = m_p // tm
        grid_k = k_p // tk

        # v7x: guarantee >=2 blocks along a "parallel" axis for small shapes,
        # otherwise one of the two TensorCores idles (grid would be (1,1,K)).
        tn_eff = tn
        if cfg["two_tensorcores"] and grid_m == 1 and (n_p // tn) == 1 and n_p > 128:
            half = n_p // 2
            tn_eff = half if half % 128 == 0 else 128
        grid_n = n_p // tn_eff

        cost = pl.CostEstimate(
            flops=2 * m_p * n_p * k_p,
            transcendentals=0,
            # x re-fetched per N block, weight per M block.
            bytes_accessed=(4 * m_p * k_p * grid_n
                            + w_itemsize * k_p * n_p * grid_m
                            + 4 * m_p * n_p + 4 * n_p),
        )

        out = pl.pallas_call(
            kernel,
            out_shape=jax.ShapeDtypeStruct((m_p, n_p), jnp.float32),
            grid_spec=pltpu.PrefetchScalarGridSpec(
                num_scalar_prefetch=0,
                grid=(grid_m, grid_n, grid_k),              # reduction axis last
                in_specs=[
                    _in_spec((tm, tk), lambda i, j, kk: (i, kk)),      # x (M,K)
                    _in_spec((tk, tn_eff), lambda i, j, kk: (kk, j)),  # w_t (K,N)
                    pl.BlockSpec((1, tn_eff), lambda i, j, kk: (0, j)),  # bias
                ],
                out_specs=pl.BlockSpec((tm, tn_eff), lambda i, j, kk: (i, j)),
                scratch_shapes=[pltpu.VMEM((tm, tn_eff), jnp.float32)],
            ),
            compiler_params=pltpu.CompilerParams(
                dimension_semantics=("parallel", "parallel", "arbitrary"),
                vmem_limit_bytes=cfg["vmem_limit_bytes"],
            ),
            cost_estimate=cost,
        )(x, w_t, b_row)

        if (m_p, n_p) != (m, n):
            out = out[:m, :n]
        return out

    return jax.jit(forward)


def _reference(x, weight, bias):
    if x.ndim > 2:
        x = x.reshape(x.shape[0], -1)
    return jnp.dot(x, weight.T, precision=lax.Precision.HIGHEST) + bias


if __name__ == "__main__":
    key = jax.random.PRNGKey(0)
    k_x, k_w, k_b = jax.random.split(key, 3)

    # x is (batch=2, channels=4, H=16, W=16) -> flattened F_in = 1024.
    batch, c, h, w = 2, 4, 16, 16
    input_feature_size = c * h * w        # 1024
    output_feature_size = 256

    x = jax.random.normal(k_x, (batch, c, h, w), dtype=jnp.float32)

    # Deterministic init mirroring nn.Linear's uniform(-1/sqrt(fan_in), +).
    bound = 1.0 / (float(input_feature_size) ** 0.5)
    weight = jax.random.uniform(
        k_w, (output_feature_size, input_feature_size),
        minval=-bound, maxval=bound, dtype=jnp.float32)
    bias = jax.random.uniform(
        k_b, (output_feature_size,),
        minval=-bound, maxval=bound, dtype=jnp.float32)

    # One-time parameter prep (transpose/pad/cast of the static weight),
    # then the per-call forward only touches x.
    forward = make_fdg_feature_generator(weight, bias)
    out = jax.block_until_ready(forward(x))

    ref = _reference(x, weight, bias)
    assert out.shape == (batch, output_feature_size), out.shape
    max_err = float(jnp.max(jnp.abs(out - ref)))
    assert jnp.allclose(out, ref, atol=1e-4, rtol=1e-4), max_err

    print("KERNEL_OK")
</pallas_src>

<mosaic_0001>
module attributes {stable_mosaic.version = 11 : i64} {
  func.func @kernel(%arg0: i32, %arg1: i32, %arg2: i32, %arg3: memref<8x512xf32, #tpu.memory_space<vmem>>, %arg4: memref<512x256xf32, #tpu.memory_space<vmem>>, %arg5: memref<1x256xf32, #tpu.memory_space<vmem>>, %arg6: memref<8x256xf32, #tpu.memory_space<vmem>>, %arg7: memref<8x256xf32, #tpu.memory_space<vmem>>) attributes {dimension_semantics = [#tpu.dimension_semantics<parallel>, #tpu.dimension_semantics<parallel>, #tpu.dimension_semantics<arbitrary>], iteration_bounds = array<i64: 1, 1, 2>, scalar_prefetch = 0 : i64, scratch_operands = 1 : i64, tpu.core_type = #tpu.core_type<tc>, window_params = [{transform_indices = @transform_0, window_bounds = array<i64: 8, 512>}, {transform_indices = @transform_1, window_bounds = array<i64: 512, 256>}, {transform_indices = @transform_2, window_bounds = array<i64: 1, 256>}, {transform_indices = @transform_3, window_bounds = array<i64: 8, 256>}]} {
    %c0_i32 = arith.constant 0 : i32
    %0 = arith.cmpi eq, %arg2, %c0_i32 : i32
    %1 = arith.extui %0 : i1 to i32
    %c0_i32_0 = arith.constant 0 : i32
    %2 = arith.cmpi ne, %1, %c0_i32_0 : i32
    scf.if %2 {
      %c0_9 = arith.constant 0 : index
      %c0_10 = arith.constant 0 : index
      %12 = vector.load %arg5[%c0_9, %c0_10] : memref<1x256xf32, #tpu.memory_space<vmem>>, vector<1x256xf32>
      %13 = vector.shape_cast %12 : vector<1x256xf32> to vector<1x256xf32>
      %14 = vector.broadcast %13 : vector<1x256xf32> to vector<8x256xf32>
      %c0_11 = arith.constant 0 : index
      %c0_12 = arith.constant 0 : index
      %15 = vector.load %arg7[%c0_11, %c0_12] : memref<8x256xf32, #tpu.memory_space<vmem>>, vector<8x256xf32>
      tpu.vector_store %arg7[%c0_11, %c0_12], %14 {strides = array<i32>} : memref<8x256xf32, #tpu.memory_space<vmem>>, vector<8x256xf32>,
    } else {
    }
    %c0 = arith.constant 0 : index
    %c0_1 = arith.constant 0 : index
    %3 = vector.load %arg3[%c0, %c0_1] : memref<8x512xf32, #tpu.memory_space<vmem>>, vector<8x512xf32>
    %c0_2 = arith.constant 0 : index
    %c0_3 = arith.constant 0 : index
    %4 = vector.load %arg7[%c0_2, %c0_3] : memref<8x256xf32, #tpu.memory_space<vmem>>, vector<8x256xf32>
    %c0_4 = arith.constant 0 : index
    %c0_5 = arith.constant 0 : index
    %5 = vector.load %arg4[%c0_4, %c0_5] : memref<512x256xf32, #tpu.memory_space<vmem>>, vector<512x256xf32>
    %cst = arith.constant dense<0.000000e+00> : vector<8x256xf32>
    %6 = tpu.matmul %3, %5, %cst {dimension_numbers = #tpu.dot_dimension_numbers<[1], [0], [0], [1], [0, 0, 1, 1], [], []>, precision = #tpu.contract_precision<fp32>} : vector<8x512xf32>, vector<512x256xf32>, vector<8x256xf32> -> vector<8x256xf32>
    %7 = arith.addf %4, %6 : vector<8x256xf32>
    %c0_6 = arith.constant 0 : index
    %c0_7 = arith.constant 0 : index
    %8 = vector.load %arg7[%c0_6, %c0_7] : memref<8x256xf32, #tpu.memory_space<vmem>>, vector<8x256xf32>
    tpu.vector_store %arg7[%c0_6, %c0_7], %7 {strides = array<i32>} : memref<8x256xf32, #tpu.memory_space<vmem>>, vector<8x256xf32>,
    %c1_i32 = arith.constant 1 : i32
    %9 = arith.cmpi eq, %arg2, %c1_i32 : i32
    %10 = arith.extui %9 : i1 to i32
    %c0_i32_8 = arith.constant 0 : i32
    %11 = arith.cmpi ne, %10, %c0_i32_8 : i32
    scf.if %11 {
      %c0_9 = arith.constant 0 : index
      %c0_10 = arith.constant 0 : index
      %12 = vector.load %arg7[%c0_9, %c0_10] : memref<8x256xf32, #tpu.memory_space<vmem>>, vector<8x256xf32>
      %c0_11 = arith.constant 0 : index
      %c0_12 = arith.constant 0 : index
      %13 = vector.load %arg6[%c0_11, %c0_12] : memref<8x256xf32, #tpu.memory_space<vmem>>, vector<8x256xf32>
      tpu.vector_store %arg6[%c0_11, %c0_12], %12 {strides = array<i32>} : memref<8x256xf32, #tpu.memory_space<vmem>>, vector<8x256xf32>,
    } else {
    }
    return
  }
  func.func @transform_0(%arg0: i32, %arg1: i32, %arg2: i32) -> (i32, i32) {
    %c0_i32 = arith.constant 0 : i32
    return %arg0, %arg2 : i32, i32
  }
  func.func @transform_1(%arg0: i32, %arg1: i32, %arg2: i32) -> (i32, i32) {
    %c0_i32 = arith.constant 0 : i32
    return %arg2, %arg1 : i32, i32
  }
  func.func @transform_2(%arg0: i32, %arg1: i32, %arg2: i32) -> (i32, i32) {
    %c0_i32 = arith.constant 0 : i32
    %c0_i32_0 = arith.constant 0 : i32
    return %c0_i32, %arg1 : i32, i32
  }
  func.func @transform_3(%arg0: i32, %arg1: i32, %arg2: i32) -> (i32, i32) {
    %c0_i32 = arith.constant 0 : i32
    return %arg0, %arg1 : i32, i32
  }
}

</mosaic_0001>

<bundles_post_ra>
// kernel: forward.1
= control target key start
LH: loop header
LB: loop body
LE: loop exit
PB: predicated region body
PF: predicated region fallthrough
CT: control target
= control target key end

     0   :  { %8 = vsyncpa [#allocation4], 0  ;;  %s5727_s0 = inlined_call_operand.vmem [shape: f32[8,1024], index: 0, kind: input, shape index: {}]   ;;  %s5728_s1 = inlined_call_operand.hbm [shape: f32[1024,256], index: 1, kind: input, shape index: {}]   ;;  %s5729_s2 = inlined_call_operand.vmem [shape: f32[1,256], index: 2, kind: input, shape index: {}]   ;;  %s5730_s3 = inlined_call_operand.vmem [shape: f32[8,256], index: 3, kind: output, shape index: {}]  }
   0x1   :  { %10 = vsyncpa [#allocation4 + $0x1], 0  ;;  %s3477_s12 = smov 0   ;;  %s3479_s13 = smov 0  }
   0x2   :  { %s3481_s14 = smov 0   ;;  %s3483_s15 = smov 0  }
   0x3   :  { %s3485_s16 = smov 0   ;;  %s3487_s17 = smov 0  }
   0x4 LB: > { %s3296_s18 = sadd.s32 4294967295, %s3453_s17   ;;  %s28_s19 = sadd.s32 1, %s3449_s16  ;;  %s3453_s17 = sphi %s3487_s17, %s16_s17   ;;  %s3449_s16 = sphi %s3485_s16, %s5985_s16   ;;  %s3445_s15 = sphi %s3483_s15, %s5984_s15   ;;  %s3441_s14 = sphi %s3481_s14, %s5983_s14   ;;  %s3437_s13 = sphi %s3479_s13, %s5982_s13   ;;  %s3433_s12 = sphi %s3477_s12, %s5981_s12  }
   0x5   : > { %p29_p0 = scmp.ge.s32.totalorder %s28_s19, 2  ;;  %s72_s20 = sadd.s32 1, %s3441_s14 }
   0x6   : > { %p79_p1 = scmp.ne.s32.totalorder %s3441_s14, %s3437_s13  ;;  %p80_p2 = scmp.eq.s32.totalorder %s3453_s17, 0 }
   0x7   : > { %s5987_s19 = smov (%p29_p0, %s28_s19), 0  ;;  %p85_p4 = scmp.ne.s32.totalorder %s3437_s13, %s3433_s12 }
   0x8   : > { %p3513_p3 = por %p80_p2, %p79_p1  ;;  %s67_s22 = ssub.s32 %s3449_s16, %s5987_s19 }
   0x9   : > { %p86_p5 = scmp.eq.s32.totalorder %s3296_s18, 0  ;;  %p70_p6 = scmp.eq.s32.totalorder %s67_s22, 0 }
   0xa   : > { %p3322_p8 = scmp.lt.s32.totalorder %s3453_s17, 2  ;;  %s184_s25 = sand.u32 1, %s3441_s14  }
   0xb   : > { %p3520_p7 = por %p86_p5, %p85_p4  ;;  %s3315_s26 = sshll.u32 %s3449_s16, 10 }
   0xc   : > { %s3526_s24 = scalar_select %p70_p6, %s3441_s14, %s72_s20  }
   0xd   : > { %s3300_s27 = sshll.u32 %s184_s25, 10  ;;  %s196_s30 = scalar_lea.hbm %s5728_s1, %s3315_s26 }
   0xe   : > { %s197_s4 = sshll.u32 %s196_s30, 4  ;;  %s188_s5 = scalar_lea.vmem [#allocation3], %s3300_s27  ;;  %s198_s4 = int_to_ptr.hbm [resolvable:$true] %s197_s4 }
   0xf   : > { %s199_s6 = sshll.u32 %s188_s5, 4  ;;  %p3319_p9 = pnand %p3322_p8, %p3513_p3  ;;  %s200_s6 = int_to_ptr.vmem [resolvable:$true] %s199_s6 }
  0x10   : > { %p3304_p10 = scmp.ge.s32.totalorder %s3453_s17, 1  ;;  %p207_p11 = scmp.lt.s32.totalorder %s3453_s17, 3 }
  0x11   : > { %s185_s7 = scalar_lea.sflag [#allocation4], %s184_s25  ;;  %s3455_s8 = smov 256  }
  0x12   : > { %s3456_s9 = smov 16   ;;  %p208_p12 = pnand %p3304_p10, %p207_p11 }
  0x13   : > { %3321 = dma.hbm_to_vmem [thread:$0]  (!%p3319_p9), %s198_s4, 16384, %s200_s6, %s185_s7, %s3455_s8, %s3455_s8, %s3456_s9  }
  0x14   : > { %211 = sbr.rel (%p208_p12) target bundleno = 599 (0x257), region = 32 }
  0x19   : > { %s213_s10 = sand.u32 1, %s3437_s13  }
  0x1a   : > { %s3305_s11 = sshll.u32 %s213_s10, 10  ;;  %s214_s12 = scalar_lea.sflag [#allocation4], %s213_s10 }
  0x1b   : > { %s3538_s18 = scalar_lea.vmem [#allocation3], %s3305_s11 }
  0x1c   : > { %3428 = dma.done.wait (%p3520_p7), %s214_s12, 16384  }
  0x1d   : > { %3430 = vsyncadd (%p3520_p7), %s214_s12, 4294950912  ;;  %s3306_s20 = sshll.u32 %s3445_s15, 2  ;;  %p3308_p0 = scmp.ne.s32.totalorder %s3445_s15, 0 }
  0x1e   : > { %p261_p13 = scmp.lt.s32.totalorder %s3306_s20, 7 }
  0x1f   : > { %288 = sbr.rel (%p3308_p0) target bundleno = 41 (0x29), region = 40 }
  0x20   : > { %s5989_s20 = smov (!%p261_p13, %s3306_s20), 7 }
  0x21   : > { %s3307_s21 = sshll.u32 %s5989_s20, 3 }
  0x22   : > { %s3548_s26 = scalar_lea.vmem %s5727_s0, %s3307_s21 }
  0x24   : > { %v289_v0 = vld [vmem:[%s5729_s2] sm:$0x3] }
  0x25   : > { %v291_v1 = vperm.slane %v289_v0, 0  ;;  %v292_v2 = vperm.slane %v289_v0, 1 }
  0x27   : > { %295 = vst [vmem:[#allocation2] sm:$0xff] %v291_v1 }
  0x28   : > { %296 = vst [vmem:[#allocation2 + $0x8] sm:$0xff] %v292_v2 }
  0x29 PF: > { %v333_v3 = vld [vmem:[%s3538_s18 + $0xf0] sm:$0xff]  ;;  %v331_v4 = vld [vmem:[%s3538_s18 + $0xe0] sm:$0xff]  ;;  %p3309_p1 = scmp.ne.s32.totalorder %s3445_s15, 1 }
  0x2a   : > { %v329_v5 = vld [vmem:[%s3538_s18 + $0xd0] sm:$0xff]  ;;  %v3557_v6 = vand.u32 4294901760, %v333_v3  ;;  %v3559_v7 = vand.u32 4294901760, %v331_v4  ;;  %v327_v9 = vld [vmem:[%s3538_s18 + $0xc0] sm:$0xff] }
  0x2b   : > { %v3561_v8 = vand.u32 4294901760, %v329_v5  ;;  %v325_v10 = vld [vmem:[%s3538_s18 + $0xb0] sm:$0xff]  ;;  %v323_v11 = vld [vmem:[%s3538_s18 + $0xa0] sm:$0xff]  ;;  %v3566_v12 = vand.u32 4294901760, %v327_v9 }
  0x2c   : > { %v3568_v13 = vand.u32 4294901760, %v325_v10  ;;  %v3570_v14 = vand.u32 4294901760, %v323_v11  ;;  %v321_v15 = vld [vmem:[%s3538_s18 + $0x90] sm:$0xff]  ;;  %v319_v16 = vld [vmem:[%s3538_s18 + $0x80] sm:$0xff]  ;;  %432 = vmatpush.msra.mxu0 %v3557_v6  ;;  %v3576_v17 = vsub.f32 %v333_v3, %v3557_v6  ;;  %v3579_v18 = vsub.f32 %v331_v4, %v3559_v7  ;;  %628 = vmatpush.msra.mxu3 %v3557_v6 }
  0x2d   : > { %v3583_v19 = vsub.f32 %v329_v5, %v3561_v8  ;;  %v3585_v20 = vand.u32 4294901760, %v321_v15  ;;  %v317_v21 = vld [vmem:[%s3538_s18 + $0x70] sm:$0xff]  ;;  %v3589_v22 = vsub.f32 %v327_v9, %v3566_v12  ;;  %v3602_v28 = vand.u32 4294901760, %v319_v16  ;;  %v315_v29 = vld [vmem:[%s3538_s18 + $0x60] sm:$0xff] }
  0x2e   : > { %v3592_v23 = vsub.f32 %v325_v10, %v3568_v13  ;;  %v3595_v24 = vsub.f32 %v323_v11, %v3570_v14  ;;  %434 = vmatpush.msra.mxu0 %v3559_v7  ;;  %575 = vmatpush.msra.mxu2 %v3576_v17  ;;  %v474_v25 = vand.u32 4294901760, %v3576_v17  ;;  %v5746_v26 = vand.u32 4294901760, %v3579_v18  ;;  %v313_v37 = vld [vmem:[%s3538_s18 + $0x50] sm:$0xff]  ;;  %v311_v45 = vld [vmem:[%s3538_s18 + $0x40] sm:$0xff] }
  0x2f   : > { %v5744_v27 = vand.u32 4294901760, %v3583_v19  ;;  %630 = vmatpush.msra.mxu3 %v3559_v7  ;;  %v5743_v30 = vand.u32 4294901760, %v3589_v22  ;;  %v3607_v31 = vand.u32 4294901760, %v317_v21  ;;  %v3610_v32 = vsub.f32 %v321_v15, %v3585_v20  ;;  %v309_v51 = vld [vmem:[%s3538_s18 + $0x30] sm:$0xff]  ;;  %v307_v57 = vld [vmem:[%s3538_s18 + $0x20] sm:$0xff] }
  0x30   : > { %436 = vmatpush.msra.mxu0 %v3561_v8  ;;  %578 = vmatpush.msra.mxu2 %v3579_v18  ;;  %v475_v33 = vsub.f32 %v3576_v17, %v474_v25  ;;  %v481_v34 = vsub.f32 %v3579_v18, %v5746_v26  ;;  %v5740_v36 = vand.u32 4294901760, %v3592_v23  ;;  %v3626_v38 = vand.u32 4294901760, %v315_v29  ;;  %v365_v62 = vld [vmem:[%s3538_s18 + $0x1f0] sm:$0xff]  ;;  %v303_v5 = vld [vmem:[%s3538_s18] sm:$0xff] }
  0x31   : > { %v487_v35 = vsub.f32 %v3583_v19, %v5744_v27  ;;  %632 = vmatpush.msra.mxu3 %v3561_v8  ;;  %v5739_v39 = vand.u32 4294901760, %v3595_v24  ;;  %v493_v42 = vsub.f32 %v3589_v22, %v5743_v30  ;;  %v3635_v43 = vsub.f32 %v319_v16, %v3602_v28  ;;  %v305_v0 = vld [vmem:[%s3538_s18 + $0x10] sm:$0xff]  ;;  %v363_v9 = vld [vmem:[%s3538_s18 + $0x1e0] sm:$0xff] }
  0x32   : > { %438 = vmatpush.msra.mxu0 %v3566_v12  ;;  %v476_v40 = vand.u32 4294901760, %v475_v33  ;;  %581 = vmatpush.msra.mxu2 %v3583_v19  ;;  %v482_v41 = vand.u32 4294901760, %v481_v34  ;;  %v3638_v44 = vand.u32 4294901760, %v313_v37  ;;  %v499_v47 = vsub.f32 %v3592_v23, %v5740_v36 }
  0x33   : > { %634 = vmatpush.msra.mxu3 %v3566_v12  ;;  %v488_v46 = vand.u32 4294901760, %v487_v35  ;;  %v5737_v48 = vand.u32 4294901760, %v3610_v32  ;;  %v3647_v49 = vsub.f32 %v317_v21, %v3607_v31  ;;  %v505_v50 = vsub.f32 %v3595_v24, %v5739_v39  ;;  %v361_v35 = vld [vmem:[%s3538_s18 + $0x1d0] sm:$0xff] }
  0x34   : > { %440 = vmatpush.msra.mxu0 %v3568_v13  ;;  %477 = vmatpush.msra.mxu1 %v476_v40  ;;  %v494_v52 = vand.u32 4294901760, %v493_v42  ;;  %v3656_v53 = vand.u32 4294901760, %v311_v45  ;;  %v5736_v54 = vand.u32 4294901760, %v3635_v43  ;;  %v3660_v55 = vsub.f32 %v315_v29, %v3626_v38 }
  0x35   : > { %584 = vmatpush.msra.mxu2 %v3589_v22  ;;  %636 = vmatpush.msra.mxu3 %v3568_v13  ;;  %v3665_v56 = vsub.f32 %v313_v37, %v3638_v44  ;;  %v500_v58 = vand.u32 4294901760, %v499_v47  ;;  %v511_v59 = vsub.f32 %v3610_v32, %v5737_v48  ;;  %v3672_v60 = vand.u32 4294901760, %v309_v51  ;;  %v359_v47 = vld [vmem:[%s3538_s18 + $0x1c0] sm:$0xff] }
  0x36   : > { %442 = vmatpush.msra.mxu0 %v3570_v14  ;;  %483 = vmatpush.msra.mxu1 %v482_v41  ;;  %v5735_v61 = vand.u32 4294901760, %v3647_v49  ;;  %v506_v63 = vand.u32 4294901760, %v505_v50  ;;  %v517_v1 = vsub.f32 %v3635_v43, %v5736_v54  ;;  %v3683_v2 = vand.u32 4294901760, %v307_v57  ;;  %v351_v48 = vld [vmem:[%s3538_s18 + $0x180] sm:$0xff] }
  0x37   : > { %587 = vmatpush.msra.mxu2 %v3592_v23  ;;  %638 = vmatpush.msra.mxu3 %v3570_v14  ;;  %v5733_v3 = vand.u32 4294901760, %v3660_v55  ;;  %v3687_v4 = vsub.f32 %v311_v45, %v3656_v53  ;;  %v5732_v10 = vand.u32 4294901760, %v3665_v56  ;;  %v3694_v11 = vand.u32 4294901760, %v365_v62 }
  0x38   : > { %444 = vmatpush.msra.mxu0 %v3585_v20  ;;  %489 = vmatpush.msra.mxu1 %v488_v46  ;;  %v512_v15 = vand.u32 4294901760, %v511_v59  ;;  %v523_v16 = vsub.f32 %v3647_v49, %v5735_v61  ;;  %v3700_v21 = vand.u32 4294901760, %v305_v0  ;;  %v3703_v29 = vsub.f32 %v309_v51, %v3672_v60 }
  0x39   : > { %590 = vmatpush.msra.mxu2 %v3595_v24  ;;  %640 = vmatpush.msra.mxu3 %v3585_v20  ;;  %v3707_v33 = vand.u32 4294901760, %v303_v5  ;;  %v3709_v34 = vand.u32 4294901760, %v363_v9  ;;  %v518_v37 = vand.u32 4294901760, %v517_v1  ;;  %v529_v40 = vsub.f32 %v3660_v55, %v5733_v3 }
  0x3a   : > { %446 = vmatpush.msra.mxu0 %v3602_v28  ;;  %495 = vmatpush.msra.mxu1 %v494_v52  ;;  %v5731_v41 = vand.u32 4294901760, %v3687_v4  ;;  %v3718_v42 = vsub.f32 %v307_v57, %v3683_v2  ;;  %v535_v45 = vsub.f32 %v3665_v56, %v5732_v10  ;;  %v3726_v46 = vsub.f32 %v365_v62, %v3694_v11  ;;  %v357_v62 = vld [vmem:[%s3538_s18 + $0x1b0] sm:$0xff] }
  0x3b   : > { %593 = vmatpush.msra.mxu2 %v3610_v32  ;;  %642 = vmatpush.msra.mxu3 %v3602_v28  ;;  %5825 = vst [vmem:[#allocation6_spill] sm:$0xff] %v3707_v33  ;;  %v524_v50 = vand.u32 4294901760, %v523_v16  ;;  %v5734_v51 = vand.u32 4294901760, %v3703_v29  ;;  %v3732_v52 = vsub.f32 %v305_v0, %v3700_v21  ;;  %v3734_v57 = vand.u32 4294901760, %v361_v35  ;;  %v355_v16 = vld [vmem:[%s3538_s18 + $0x1a0] sm:$0xff] }
  0x3c   : > { %448 = vmatpush.msra.mxu0 %v3607_v31  ;;  %501 = vmatpush.msra.mxu1 %v500_v58  ;;  %v3739_v58 = vsub.f32 %v303_v5, %v3707_v33  ;;  %v3742_v59 = vsub.f32 %v363_v9, %v3709_v34  ;;  %v541_v0 = vsub.f32 %v3687_v4, %v5731_v41  ;;  %v5738_v1 = vand.u32 4294901760, %v3718_v42 }
  0x3d   : > { %596 = vmatpush.msra.mxu2 %v3635_v43  ;;  %644 = vmatpush.msra.mxu3 %v3607_v31  ;;  %v536_v5 = vand.u32 4294901760, %v535_v45  ;;  %v5741_v9 = vand.u32 4294901760, %v3726_v46  ;;  %v3762_v41 = vsub.f32 %v361_v35, %v3734_v57  ;;  %v3764_v10 = vand.u32 4294901760, %v357_v62  ;;  %v353_v45 = vld [vmem:[%s3538_s18 + $0x190] sm:$0xff] }
  0x3e   : > { %450 = vmatpush.msra.mxu0 %v3626_v38  ;;  %507 = vmatpush.msra.mxu1 %v506_v63  ;;  %v530_v63 = vand.u32 4294901760, %v529_v40  ;;  %v5742_v40 = vand.u32 4294901760, %v3732_v52  ;;  %v5747_v3 = vand.u32 4294901760, %v3739_v58  ;;  %v553_v35 = vsub.f32 %v3718_v42, %v5738_v1 }
  0x3f   : > { %599 = vmatpush.msra.mxu2 %v3647_v49  ;;  %646 = vmatpush.msra.mxu3 %v3626_v38  ;;  %v3778_v54 = vand.u32 4294901760, %v355_v16  ;;  %v5748_v39 = vand.u32 4294901760, %v3762_v41  ;;  %v3794_v36 = vsub.f32 %v357_v62, %v3764_v10 }
  0x40   : > { %452 = vmatpush.msra.mxu0 %v3638_v44  ;;  %513 = vmatpush.msra.mxu1 %v512_v15  ;;  %v3750_v15 = vand.u32 4294901760, %v359_v47  ;;  %v565_v62 = vsub.f32 %v3739_v58, %v5747_v3 }
  0x41   : > { %602 = vmatpush.msra.mxu2 %v3660_v55  ;;  %648 = vmatpush.msra.mxu3 %v3638_v44  ;;  %v3810_v27 = vsub.f32 %v355_v16, %v3778_v54  ;;  %v828_v16 = vsub.f32 %v3762_v41, %v5748_v39 }
  0x42   : > { %454 = vmatpush.msra.mxu0 %v3656_v53  ;;  %519 = vmatpush.msra.mxu1 %v518_v37  ;;  %v547_v37 = vsub.f32 %v3703_v29, %v5734_v51  ;;  %v542_v51 = vand.u32 4294901760, %v541_v0  ;;  %v3776_v61 = vsub.f32 %v359_v47, %v3750_v15  ;;  %v3786_v0 = vand.u32 4294901760, %v353_v45 }
  0x43   : > { %605 = vmatpush.msra.mxu2 %v3665_v56  ;;  %650 = vmatpush.msra.mxu3 %v3656_v53  ;;  %v559_v47 = vsub.f32 %v3732_v52, %v5742_v40  ;;  %v554_v40 = vand.u32 4294901760, %v553_v35 }
  0x44   : > { %456 = vmatpush.msra.mxu0 %v3672_v60  ;;  %525 = vmatpush.msra.mxu1 %v524_v50  ;;  %v5745_v50 = vand.u32 4294901760, %v3742_v59  ;;  %v548_v1 = vand.u32 4294901760, %v547_v37  ;;  %v349_v37 = vld [vmem:[%s3538_s18 + $0x170] sm:$0xff]  ;;  %v5749_v30 = vand.u32 4294901760, %v3776_v61  ;;  %v3816_v26 = vsub.f32 %v353_v45, %v3786_v0 }
  0x45   : > { %608 = vmatpush.msra.mxu2 %v3687_v4  ;;  %652 = vmatpush.msra.mxu3 %v3672_v60  ;;  %v560_v35 = vand.u32 4294901760, %v559_v47  ;;  %v3824_v17 = vand.u32 4294901760, %v349_v37  ;;  %v566_v47 = vand.u32 4294901760, %v565_v62  ;;  %v5828_v62 = vand.u32 4294901760, %v3794_v36 }
  0x46   : > { %458 = vmatpush.msra.mxu0 %v3683_v2  ;;  %531 = vmatpush.msra.mxu1 %v530_v63  ;;  %v816_v63 = vsub.f32 %v3726_v46, %v5741_v9  ;;  %v822_v9 = vsub.f32 %v3742_v59, %v5745_v50  ;;  %v834_v39 = vsub.f32 %v3776_v61, %v5749_v30 }
  0x47   : > { %611 = vmatpush.msra.mxu2 %v3703_v29  ;;  %654 = vmatpush.msra.mxu3 %v3683_v2  ;;  %v840_v30 = vsub.f32 %v3794_v36, %v5828_v62  ;;  %v3849_v3 = vsub.f32 %v349_v37, %v3824_v17 }
  0x48   : > { %460 = vmatpush.msra.mxu0 %v3700_v21  ;;  %537 = vmatpush.msra.mxu1 %v536_v5  ;;  %v3801_v5 = vand.u32 4294901760, %v351_v48  ;;  %v817_v50 = vand.u32 4294901760, %v816_v63  ;;  %v823_v45 = vand.u32 4294901760, %v822_v9  ;;  %v345_v63 = vld [vmem:[%s3538_s18 + $0x150] sm:$0xff]  ;;  %v343_v9 = vld [vmem:[%s3538_s18 + $0x140] sm:$0xff] }
  0x49   : > { %614 = vmatpush.msra.mxu2 %v3718_v42  ;;  %656 = vmatpush.msra.mxu3 %v3700_v21 }
  0x4a   : > { %462 = vmatpush.msra.mxu0 %v3707_v33  ;;  %543 = vmatpush.msra.mxu1 %v542_v51  ;;  %v347_v51 = vld [vmem:[%s3538_s18 + $0x160] sm:$0xff] }
  0x4b   : > { %617 = vmatpush.msra.mxu2 %v3732_v52  ;;  %658 = vmatpush.msra.mxu3 %v3707_v33  ;;  %v3851_v33 = vand.u32 4294901760, %v345_v63 }
  0x4c   : > { %669 = vmatpush.msrb.mxu0 %v474_v25  ;;  %549 = vmatpush.msra.mxu1 %v548_v1  ;;  %v5826_v25 = vand.u32 4294901760, %v3579_v18  ;;  %v3830_v1 = vsub.f32 %v351_v48, %v3801_v5  ;;  %v3838_v18 = vand.u32 4294901760, %v347_v51  ;;  %v3864_v48 = vand.u32 4294901760, %v343_v9 }
  0x4d   : > { %620 = vmatpush.msra.mxu2 %v3739_v58  ;;  %818 = vmatpush.msrb.mxu3 %v817_v50 }
  0x4e   : > { %673 = vmatpush.msrb.mxu0 %v5826_v25  ;;  %555 = vmatpush.msra.mxu1 %v554_v40  ;;  %v5827_v25 = vand.u32 4294901760, %v3583_v19  ;;  %v829_v40 = vand.u32 4294901760, %v828_v16  ;;  %v5829_v19 = vand.u32 4294901760, %v3589_v22  ;;  %v835_v16 = vand.u32 4294901760, %v834_v39  ;;  %v297_v39 = vld [vmem:[%s3548_s26] sm:$0xff] }
  0x4f   : > { %773 = vmatpush.msrb.mxu2 %v3694_v11  ;;  %824 = vmatpush.msrb.mxu3 %v823_v45  ;;  %v3862_v37 = vsub.f32 %v347_v51, %v3838_v18  ;;  %v5831_v22 = vand.u32 4294901760, %v3592_v23  ;;  %v5832_v45 = vand.u32 4294901760, %v3816_v26  ;;  %v3876_v51 = vsub.f32 %v345_v63, %v3851_v33 }
  0x50   : > { %677 = vmatpush.msrb.mxu0 %v5827_v25  ;;  %561 = vmatpush.msra.mxu1 %v560_v35  ;;  %v341_v35 = vld [vmem:[%s3538_s18 + $0x130] sm:$0xff]  ;;  %v5830_v25 = vand.u32 4294901760, %v3810_v27  ;;  %v5833_v23 = vand.u32 4294901760, %v3595_v24  ;;  %v3890_v63 = vsub.f32 %v343_v9, %v3864_v48  ;;  %v5836_v24 = vand.u32 4294901760, %v3610_v32  ;;  %v335_v9 = vld [vmem:[%s3538_s18 + $0x100] sm:$0xff] }
  0x51   : > { %775 = vmatpush.msrb.mxu2 %v3709_v34  ;;  %830 = vmatpush.msrb.mxu3 %v829_v40  ;;  %v3878_v50 = vand.u32 4294901760, %v341_v35  ;;  %v5838_v32 = vand.u32 4294901760, %v3635_v43  ;;  %v5841_v43 = vand.u32 4294901760, %v3647_v49 }
  0x52   : > { %681 = vmatpush.msrb.mxu0 %v5829_v19  ;;  %567 = vmatpush.msra.mxu1 %v566_v47  ;;  %v846_v62 = vsub.f32 %v3810_v27, %v5830_v25  ;;  %v852_v47 = vsub.f32 %v3816_v26, %v5832_v45  ;;  %v841_v19 = vand.u32 4294901760, %v840_v30  ;;  %v339_v45 = vld [vmem:[%s3538_s18 + $0x120] sm:$0xff]  ;;  %v3892_v25 = vand.u32 4294901760, %v297_v39 }
  0x53   : > { %777 = vmatpush.msrb.mxu2 %v3734_v57  ;;  %836 = vmatpush.msrb.mxu3 %v835_v16  ;;  %v5837_v16 = vand.u32 4294901760, %v3849_v3  ;;  %v3906_v40 = vsub.f32 %v341_v35, %v3878_v50 }
  0x54   : > { %685 = vmatpush.msrb.mxu0 %v5831_v22  ;;  %736 = vmatpush.msrb.mxu1 %v3557_v6  ;;  %v5834_v6 = vand.u32 4294901760, %v3830_v1  ;;  %v847_v30 = vand.u32 4294901760, %v846_v62  ;;  %5835 = vst [vmem:[#allocation7_spill] sm:$0xff] %v3892_v25 }
  0x55   : > { %779 = vmatpush.msrb.mxu2 %v3750_v15  ;;  %842 = vmatpush.msrb.mxu3 %v841_v19  ;;  %v864_v62 = vsub.f32 %v3849_v3, %v5837_v16  ;;  %v3917_v16 = vsub.f32 %v297_v39, %v3892_v25  ;;  %v887_v39 = vand.u32 4294901760, %v3906_v40 }
  0x56   : > { %689 = vmatpush.msrb.mxu0 %v5833_v23  ;;  %738 = vmatpush.msrb.mxu1 %v3559_v7  ;;  %v858_v22 = vsub.f32 %v3830_v1, %v5834_v6  ;;  %v853_v7 = vand.u32 4294901760, %v852_v47  ;;  %v337_v23 = vld [vmem:[%s3538_s18 + $0x110] sm:$0xff]  ;;  %v3903_v6 = vand.u32 4294901760, %v339_v45  ;;  %v5839_v47 = vand.u32 4294901760, %v3862_v37 }
  0x57   : > { %781 = vmatpush.msrb.mxu2 %v3764_v10  ;;  %848 = vmatpush.msrb.mxu3 %v847_v30  ;;  %5840 = vst [vmem:[#allocation8_spill] sm:$0xff] %v3917_v16  ;;  %v3919_v35 = vand.u32 4294901760, %v337_v23 }
  0x58   : > { %693 = vmatpush.msrb.mxu0 %v5836_v24  ;;  %740 = vmatpush.msrb.mxu1 %v3561_v8  ;;  %v859_v8 = vand.u32 4294901760, %v858_v22  ;;  %v870_v19 = vsub.f32 %v3862_v37, %v5839_v47  ;;  %v881_v24 = vand.u32 4294901760, %v3890_v63  ;;  %v5842_v22 = vand.u32 4294901760, %v3876_v51 }
  0x59   : > { %783 = vmatpush.msrb.mxu2 %v3778_v54  ;;  %854 = vmatpush.msrb.mxu3 %v853_v7  ;;  %v5843_v47 = vand.u32 4294901760, %v3660_v55  ;;  %v5845_v55 = vand.u32 4294901760, %v3665_v56 }
  0x5a   : > { %697 = vmatpush.msrb.mxu0 %v5838_v32  ;;  %742 = vmatpush.msrb.mxu1 %v3566_v12  ;;  %v865_v12 = vand.u32 4294901760, %v864_v62  ;;  %v876_v30 = vsub.f32 %v3876_v51, %v5842_v22  ;;  %v3931_v32 = vsub.f32 %v339_v45, %v3903_v6  ;;  %v871_v49 = vand.u32 4294901760, %v870_v19 }
  0x5b   : > { %785 = vmatpush.msrb.mxu2 %v3786_v0  ;;  %860 = vmatpush.msrb.mxu3 %v859_v8  ;;  %v882_v7 = vsub.f32 %v3890_v63, %v881_v24  ;;  %v3943_v62 = vand.u32 4294901760, %v3917_v16  ;;  %v3946_v45 = vsub.f32 %v337_v23, %v3919_v35  ;;  %v888_v19 = vsub.f32 %v3906_v40, %v887_v39 }
  0x5c   : > { %701 = vmatpush.msrb.mxu0 %v5841_v43  ;;  %744 = vmatpush.msrb.mxu1 %v3568_v13  ;;  %v3936_v13 = vand.u32 4294901760, %v335_v9  ;;  %v877_v8 = vand.u32 4294901760, %v876_v30  ;;  %v893_v43 = vand.u32 4294901760, %v3931_v32  ;;  %v5846_v22 = vand.u32 4294901760, %v3687_v4 }
  0x5d   : > { %787 = vmatpush.msrb.mxu2 %v3801_v5  ;;  %5844 = vst [vmem:[#allocation9_spill] sm:$0xff] %v3943_v62  ;;  %866 = vmatpush.msrb.mxu3 %v865_v12  ;;  %v466_v23 = vsub.f32 %v3917_v16, %v3943_v62  ;;  %v899_v12 = vand.u32 4294901760, %v3946_v45 }
  0x5e   : > { %705 = vmatpush.msrb.mxu0 %v5843_v47  ;;  %746 = vmatpush.msrb.mxu1 %v3570_v14  ;;  %v298_v14 = vld [vmem:[%s3548_s26 + $0x8] sm:$0xff]  ;;  %v3961_v56 = vsub.f32 %v335_v9, %v3936_v13  ;;  %v5848_v47 = vand.u32 4294901760, %v3703_v29  ;;  %v894_v4 = vsub.f32 %v3931_v32, %v893_v43  ;;  %v5849_v9 = vand.u32 4294901760, %v3718_v42 }
  0x5f   : > { %789 = vmatpush.msrb.mxu2 %v3824_v17  ;;  %872 = vmatpush.msrb.mxu3 %v871_v49  ;;  %v3967_v30 = vand.u32 4294901760, %v298_v14  ;;  %v3981_v29 = vand.u32 4294901760, %v466_v23  ;;  %v5853_v42 = vand.u32 4294901760, %v3739_v58 }
  0x60   : > { %709 = vmatpush.msrb.mxu0 %v5845_v55  ;;  %748 = vmatpush.msrb.mxu1 %v3585_v20  ;;  %v883_v20 = vand.u32 4294901760, %v882_v7  ;;  %v905_v49 = vand.u32 4294901760, %v3961_v56  ;;  %v5852_v55 = vand.u32 4294901760, %v3732_v52 }
  0x61   : > { %791 = vmatpush.msrb.mxu2 %v3838_v18  ;;  %5847 = vst [vmem:[#allocation10_spill] sm:$0xff] %v3967_v30  ;;  %878 = vmatpush.msrb.mxu3 %v877_v8  ;;  %v3987_v7 = vsub.f32 %v298_v14, %v3967_v30 }
  0x62   : > { %713 = vmatpush.msrb.mxu0 %v5846_v22  ;;  %750 = vmatpush.msrb.mxu1 %v3602_v28  ;;  %v889_v28 = vand.u32 4294901760, %v888_v19  ;;  %5850 = vst [vmem:[#allocation11_spill] sm:$0xff] %v3981_v29  ;;  %v906_v8 = vsub.f32 %v3961_v56, %v905_v49  ;;  %v5858_v19 = vld [vmem:[#allocation6_spill] sm:$0xff] }
  0x63   : > { %793 = vmatpush.msrb.mxu2 %v3851_v33  ;;  %884 = vmatpush.msrb.mxu3 %v883_v20  ;;  %5851 = vst [vmem:[#allocation12_spill] sm:$0xff] %v3987_v7  ;;  %v381_v20 = vld [vmem:[%s3538_s18 + $0x270] sm:$0xff] }
  0x64   : > { %717 = vmatpush.msrb.mxu0 %v5848_v47  ;;  %752 = vmatpush.msrb.mxu1 %v3607_v31  ;;  %v900_v31 = vsub.f32 %v3946_v45, %v899_v12 }
  0x65   : > { %795 = vmatpush.msrb.mxu2 %v3864_v48  ;;  %890 = vmatpush.msrb.mxu3 %v889_v28  ;;  %v379_v28 = vld [vmem:[%s3538_s18 + $0x260] sm:$0xff] }
  0x66   : > { %721 = vmatpush.msrb.mxu0 %v5849_v9  ;;  %754 = vmatpush.msrb.mxu1 %v3626_v38  ;;  %v895_v38 = vand.u32 4294901760, %v894_v4  ;;  %v901_v52 = vand.u32 4294901760, %v900_v31 }
  0x67   : > { %797 = vmatpush.msrb.mxu2 %v3878_v50  ;;  %468 = vmatmul.f32.vlgmr.msra.gmra.mxu0 %v3981_v29  ;;  %v405_v29 = vld [vmem:[%s3538_s18 + $0x330] sm:$0xff] }
  0x68   : > { %725 = vmatpush.msrb.mxu0 %v5852_v55  ;;  %756 = vmatpush.msrb.mxu1 %v3638_v44  ;;  %v4002_v44 = vand.u32 4294901760, %v3987_v7  ;;  %v377_v55 = vld [vmem:[%s3538_s18 + $0x250] sm:$0xff] }
  0x69   : > { %799 = vmatpush.msrb.mxu2 %v3903_v6  ;;  %896 = vmatpush.msrb.mxu3 %v895_v38 }
  0x6a   : > { %729 = vmatpush.msrb.mxu0 %v5853_v42  ;;  %758 = vmatpush.msrb.mxu1 %v3656_v53  ;;  %5854 = vst [vmem:[#allocation13_spill] sm:$0xff] %v4002_v44  ;;  %v907_v53 = vand.u32 4294901760, %v906_v8  ;;  %v807_v58 = vsub.f32 %v3987_v7, %v4002_v44  ;;  %v4179_v8 = vand.u32 4294901760, %v379_v28 }
  0x6b   : > { %801 = vmatpush.msrb.mxu2 %v3919_v35  ;;  %902 = vmatpush.msrb.mxu3 %v901_v52 }
  0x6c   : > { %916 = vmatpush.msra.mxu0 %v3726_v46  ;;  %760 = vmatpush.msrb.mxu1 %v3672_v60  ;;  %v5855_v60 = vand.u32 4294901760, %v3726_v46  ;;  %v4021_v14 = vand.u32 4294901760, %v807_v58  ;;  %v5860_v46 = vand.u32 4294901760, %v3776_v61 }
  0x6d   : > { %623 = vmatmul.f32.vlgmr.msra.gmra.mxu2 %v3917_v16  ;;  %662 = vmatmul.f32.vlgmr.msra.gmra.mxu3 %v3943_v62 }
  0x6e   : > { %919 = vmatpush.msra.mxu0 %v3742_v59  ;;  %762 = vmatpush.msrb.mxu1 %v3683_v2  ;;  %v5856_v2 = vand.u32 4294901760, %v3742_v59  ;;  %5857 = vst [vmem:[#allocation14_spill] sm:$0xff] %v4021_v14 }
  0x6f   : > { %803 = vmatpush.msrb.mxu2 %v3936_v13  ;;  %908 = vmatpush.msrb.mxu3 %v907_v53  ;;  %v375_v53 = vld [vmem:[%s3538_s18 + $0x240] sm:$0xff] }
  0x70   : > { %922 = vmatpush.msra.mxu0 %v3762_v41  ;;  %764 = vmatpush.msrb.mxu1 %v3700_v21  ;;  %v5859_v21 = vand.u32 4294901760, %v3762_v41 }
  0x71   : > { %1010 = vmatpush.msra.mxu2 %v5855_v60  ;;  %569 = vmatmul.f32.vlgmr.msra.gmra.mxu1 %v3892_v25  ;;  %v4191_v60 = vand.u32 4294901760, %v377_v55 }
  0x72   : > { %925 = vmatpush.msra.mxu0 %v3776_v61  ;;  %1077 = vmatpush.msra.mxu3 %v3694_v11  ;;  %v5862_v61 = vand.u32 4294901760, %v3810_v27 }
  0x73   : > { %1014 = vmatpush.msra.mxu2 %v5856_v2  ;;  %766 = vmatpush.msrb.mxu1 %v5858_v19 }
  0x74   : > { %928 = vmatpush.msra.mxu0 %v3794_v36  ;;  %1079 = vmatpush.msra.mxu3 %v3709_v34 }
  0x75   : > { %969 = vmatpush.msra.mxu1 %v3694_v11  ;;  %1018 = vmatpush.msra.mxu2 %v5859_v21  ;;  %v5861_v11 = vand.u32 4294901760, %v3794_v36  ;;  %v5863_v36 = vand.u32 4294901760, %v3816_v26  ;;  %v299_v21 = vld [vmem:[%s3548_s26 + $0x10] sm:$0xff] }
  0x76   : > { %809 = vmatmul.f32.vlgmr.msrb.gmra.mxu2 %v4021_v14  ;;  %931 = vmatpush.msra.mxu0 %v3810_v27  ;;  %v397_v27 = vld [vmem:[%s3538_s18 + $0x2f0] sm:$0xff] }
  0x77   : > { %971 = vmatpush.msra.mxu1 %v3709_v34  ;;  %1022 = vmatpush.msra.mxu2 %v5860_v46  ;;  %v5864_v34 = vand.u32 4294901760, %v3830_v1  ;;  %v4071_v41 = vand.u32 4294901760, %v397_v27 }
  0x78   : > { %1081 = vmatpush.msra.mxu3 %v3734_v57  ;;  %731 = vmatmul.f32.vlgmr.msrb.gmra.mxu0 %v3892_v25 }
  0x79   : > { %910 = vmatmul.f32.vlgmr.msrb.gmra.mxu3 %v3967_v30  ;;  %934 = vmatpush.msra.mxu0 %v3816_v26  ;;  %v5865_v26 = vand.u32 4294901760, %v3849_v3 }
  0x7a   : > { %973 = vmatpush.msra.mxu1 %v3734_v57  ;;  %1026 = vmatpush.msra.mxu2 %v5861_v11  ;;  %v5867_v57 = vand.u32 4294901760, %v3876_v51  ;;  %v373_v11 = vld [vmem:[%s3538_s18 + $0x230] sm:$0xff] }
  0x7b   : > { %1083 = vmatpush.msra.mxu3 %v3750_v15  ;;  %768 = vmatmul.f32.vlgmr.msrb.gmra.mxu1 %v3892_v25  ;;  %v413_v25 = vld [vmem:[%s3538_s18 + $0x370] sm:$0xff] }
  0x7c   : > { %937 = vmatpush.msra.mxu0 %v3830_v1  ;;  %975 = vmatpush.msra.mxu1 %v3750_v15  ;;  %v391_v15 = vld [vmem:[%s3538_s18 + $0x2c0] sm:$0xff]  ;;  %v4394_v16 = vand.u32 4294901760, %v413_v25 }
  0x7d   : > { %1030 = vmatpush.msra.mxu2 %v5862_v61  ;;  %1085 = vmatpush.msra.mxu3 %v3764_v10  ;;  %v4098_v1 = vand.u32 4294901760, %v391_v15 }
  0x7e   : > { %940 = vmatpush.msra.mxu0 %v3849_v3  ;;  %977 = vmatpush.msra.mxu1 %v3764_v10  ;;  %v5866_v10 = vand.u32 4294901760, %v3862_v37  ;;  %v393_v3 = vld [vmem:[%s3538_s18 + $0x2d0] sm:$0xff] }
  0x7f   : > { %1034 = vmatpush.msra.mxu2 %v5863_v36  ;;  %1087 = vmatpush.msra.mxu3 %v3778_v54  ;;  %v4205_v36 = vand.u32 4294901760, %v375_v53 }
  0x80   : > { %943 = vmatpush.msra.mxu0 %v3862_v37  ;;  %979 = vmatpush.msra.mxu1 %v3778_v54  ;;  %v395_v54 = vld [vmem:[%s3538_s18 + $0x2e0] sm:$0xff] }
  0x81   : > { %1038 = vmatpush.msra.mxu2 %v5864_v34  ;;  %1089 = vmatpush.msra.mxu3 %v3786_v0  ;;  %v4079_v59 = vand.u32 4294901760, %v395_v54  ;;  %v387_v37 = vld [vmem:[%s3538_s18 + $0x2a0] sm:$0xff] }
  0x82   : > { %946 = vmatpush.msra.mxu0 %v3876_v51  ;;  %981 = vmatpush.msra.mxu1 %v3786_v0  ;;  %v4087_v0 = vand.u32 4294901760, %v393_v3 }
  0x83   : > { %1042 = vmatpush.msra.mxu2 %v5865_v26  ;;  %1091 = vmatpush.msra.mxu3 %v3801_v5 }
  0x84   : > { %949 = vmatpush.msra.mxu0 %v3890_v63  ;;  %983 = vmatpush.msra.mxu1 %v3801_v5  ;;  %v4090_v5 = vsub.f32 %v397_v27, %v4071_v41  ;;  %v4117_v63 = vand.u32 4294901760, %v387_v37  ;;  %v4209_v27 = vsub.f32 %v379_v28, %v4179_v8 }
  0x85   : > { %1046 = vmatpush.msra.mxu2 %v5866_v10  ;;  %1093 = vmatpush.msra.mxu3 %v3824_v17  ;;  %v4214_v10 = vand.u32 4294901760, %v299_v21 }
  0x86   : > { %952 = vmatpush.msra.mxu0 %v3906_v40  ;;  %985 = vmatpush.msra.mxu1 %v3824_v17  ;;  %v389_v17 = vld [vmem:[%s3538_s18 + $0x2b0] sm:$0xff]  ;;  %v4113_v40 = vsub.f32 %v393_v3, %v4087_v0 }
  0x87   : > { %1050 = vmatpush.msra.mxu2 %v5867_v57  ;;  %1095 = vmatpush.msra.mxu3 %v3838_v18  ;;  %v4106_v51 = vand.u32 4294901760, %v389_v17  ;;  %5868 = vst [vmem:[#allocation6_spill] sm:$0xff] %v4214_v10  ;;  %v4220_v57 = vand.u32 4294901760, %v373_v11  ;;  %v4242_v28 = vsub.f32 %v299_v21, %v4214_v10 }
  0x88   : > { %955 = vmatpush.msra.mxu0 %v3931_v32  ;;  %987 = vmatpush.msra.mxu1 %v3838_v18  ;;  %v4101_v18 = vsub.f32 %v395_v54, %v4079_v59  ;;  %v383_v32 = vld [vmem:[%s3538_s18 + $0x280] sm:$0xff]  ;;  %v5760_v22 = vand.u32 4294901760, %v4113_v40 }
  0x89   : > { %1054 = vmatpush.msra.mxu2 %v881_v24  ;;  %1097 = vmatpush.msra.mxu3 %v3851_v33  ;;  %v4153_v23 = vand.u32 4294901760, %v383_v32  ;;  %v371_v54 = vld [vmem:[%s3538_s18 + $0x220] sm:$0xff]  ;;  %5869 = vst [vmem:[#allocation15_spill] sm:$0xff] %v4242_v28 }
  0x8a   : > { %958 = vmatpush.msra.mxu0 %v3946_v45  ;;  %989 = vmatpush.msra.mxu1 %v3851_v33  ;;  %v5763_v33 = vand.u32 4294901760, %v4090_v5  ;;  %v5762_v24 = vand.u32 4294901760, %v4101_v18  ;;  %v1169_v9 = vsub.f32 %v4113_v40, %v5760_v22  ;;  %v421_v22 = vld [vmem:[%s3538_s18 + $0x3b0] sm:$0xff] }
  0x8b   : > { %1058 = vmatpush.msra.mxu2 %v887_v39  ;;  %1099 = vmatpush.msra.mxu3 %v3864_v48  ;;  %v4125_v39 = vsub.f32 %v391_v15, %v4098_v1  ;;  %v4182_v52 = vsub.f32 %v383_v32, %v4153_v23  ;;  %v4232_v32 = vand.u32 4294901760, %v371_v54 }
  0x8c   : > { %961 = vmatpush.msra.mxu0 %v3961_v56  ;;  %991 = vmatpush.msra.mxu1 %v3864_v48  ;;  %v385_v48 = vld [vmem:[%s3538_s18 + $0x290] sm:$0xff]  ;;  %v1157_v45 = vsub.f32 %v4090_v5, %v5763_v33  ;;  %v1163_v56 = vsub.f32 %v4101_v18, %v5762_v24  ;;  %v1170_v58 = vand.u32 4294901760, %v1169_v9 }
  0x8d   : > { %1062 = vmatpush.msra.mxu2 %v893_v43  ;;  %1101 = vmatpush.msra.mxu3 %v3878_v50  ;;  %v4139_v43 = vand.u32 4294901760, %v385_v48  ;;  %v5754_v34 = vand.u32 4294901760, %v4182_v52 }
  0x8e   : > { %964 = vmatmul.f32.vlgmr.msra.gmra.mxu0 %v3987_v7  ;;  %993 = vmatpush.msra.mxu1 %v3878_v50  ;;  %v4130_v50 = vsub.f32 %v389_v17, %v4106_v51  ;;  %v1158_v4 = vand.u32 4294901760, %v1157_v45  ;;  %v1164_v38 = vand.u32 4294901760, %v1163_v56  ;;  %v4224_v17 = vsub.f32 %v377_v55, %v4191_v60  ;;  %v369_v56 = vld [vmem:[%s3538_s18 + $0x210] sm:$0xff] }
  0x8f   : > { %1114 = vmatpush.msrb.mxu0 %v4071_v41  ;;  %1066 = vmatpush.msra.mxu2 %v899_v12  ;;  %v5759_v12 = vand.u32 4294901760, %v4125_v39  ;;  %v4168_v31 = vsub.f32 %v385_v48, %v4139_v43  ;;  %v1199_v48 = vsub.f32 %v4182_v52, %v5754_v34  ;;  %v5751_v45 = vand.u32 4294901760, %v4209_v27 }
  0x90   : > { %1103 = vmatpush.msra.mxu3 %v3903_v6  ;;  %995 = vmatpush.msra.mxu1 %v3903_v6  ;;  %v4145_v6 = vsub.f32 %v387_v37, %v4117_v63  ;;  %v5758_v47 = vand.u32 4294901760, %v4130_v50  ;;  %v5753_v55 = vand.u32 4294901760, %v4224_v17 }
  0x91   : > { %1116 = vmatpush.msrb.mxu0 %v4079_v59  ;;  %1070 = vmatpush.msra.mxu2 %v905_v49  ;;  %v4165_v49 = vand.u32 4294901760, %v381_v20  ;;  %v1175_v42 = vsub.f32 %v4125_v39, %v5759_v12  ;;  %v5755_v2 = vand.u32 4294901760, %v4168_v31  ;;  %v1211_v21 = vsub.f32 %v4209_v27, %v5751_v45 }
  0x92   : > { %1105 = vmatpush.msra.mxu3 %v3919_v35  ;;  %1072 = vmatmul.f32.vlgmr.msra.gmra.mxu2 %v3967_v30 }
  0x93   : > { %1118 = vmatpush.msrb.mxu0 %v4087_v0  ;;  %1257 = vmatpush.msrb.mxu2 %v4090_v5  ;;  %v4195_v19 = vsub.f32 %v381_v20, %v4165_v49  ;;  %v1176_v61 = vand.u32 4294901760, %v1175_v42  ;;  %v1193_v3 = vsub.f32 %v4168_v31, %v5755_v2  ;;  %v4236_v20 = vsub.f32 %v375_v53, %v4205_v36  ;;  %v429_v42 = vld [vmem:[%s3538_s18 + $0x3f0] sm:$0xff]  ;;  %v367_v53 = vld [vmem:[%s3538_s18 + $0x200] sm:$0xff] }
  0x94   : > { %997 = vmatpush.msra.mxu1 %v3919_v35  ;;  %1107 = vmatpush.msra.mxu3 %v3936_v13  ;;  %v5756_v35 = vand.u32 4294901760, %v4145_v6 }
  0x95   : > { %1109 = vmatmul.f32.vlgmr.msra.gmra.mxu3 %v3967_v30  ;;  %1120 = vmatpush.msrb.mxu0 %v4098_v1  ;;  %v5752_v15 = vand.u32 4294901760, %v4195_v19  ;;  %v5874_v30 = vand.u32 4294901760, %v4090_v5 }
  0x96   : > { %1260 = vmatpush.msrb.mxu2 %v4101_v18  ;;  %1310 = vmatpush.msrb.mxu3 %v4071_v41  ;;  %v1187_v46 = vsub.f32 %v4145_v6, %v5756_v35  ;;  %v423_v35 = vld [vmem:[%s3538_s18 + $0x3c0] sm:$0xff] }
  0x97   : > { %999 = vmatpush.msra.mxu1 %v3936_v13  ;;  %1122 = vmatpush.msrb.mxu0 %v4106_v51  ;;  %v1181_v13 = vsub.f32 %v4130_v50, %v5758_v47  ;;  %v1205_v9 = vsub.f32 %v4195_v19, %v5752_v15 }
  0x98   : > { %1003 = vmatmul.f32.vlgmr.msra.gmra.mxu1 %v4002_v44  ;;  %1263 = vmatpush.msrb.mxu2 %v4113_v40  ;;  %v1188_v37 = vand.u32 4294901760, %v1187_v46  ;;  %v5757_v46 = vand.u32 4294901760, %v4236_v20 }
  0x99   : > { %1159 = vmatpush.msrb.mxu1 %v1158_v4  ;;  %1312 = vmatpush.msrb.mxu3 %v4079_v59  ;;  %v1182_v26 = vand.u32 4294901760, %v1181_v13  ;;  %v1194_v4 = vand.u32 4294901760, %v1193_v3  ;;  %v4255_v13 = vand.u32 4294901760, %v369_v56  ;;  %v427_v3 = vld [vmem:[%s3538_s18 + $0x3e0] sm:$0xff] }
  0x9a   : > { %1124 = vmatpush.msrb.mxu0 %v4117_v63  ;;  %1266 = vmatpush.msrb.mxu2 %v4125_v39  ;;  %v4292_v2 = vand.u32 4294901760, %v427_v3 }
  0x9b   : > { %1165 = vmatpush.msrb.mxu1 %v1164_v38  ;;  %1314 = vmatpush.msrb.mxu3 %v4087_v0  ;;  %v4250_v38 = vsub.f32 %v373_v11, %v4220_v57  ;;  %v4264_v11 = vsub.f32 %v371_v54, %v4232_v32  ;;  %v1217_v54 = vsub.f32 %v4224_v17, %v5753_v55 }
  0x9c   : > { %1126 = vmatpush.msrb.mxu0 %v4139_v43  ;;  %1269 = vmatpush.msrb.mxu2 %v4130_v50  ;;  %v4284_v15 = vsub.f32 %v369_v56, %v4255_v13  ;;  %v1223_v55 = vsub.f32 %v4236_v20, %v5757_v46 }
  0x9d   : > { %1171 = vmatpush.msrb.mxu1 %v1170_v58  ;;  %1316 = vmatpush.msrb.mxu3 %v4098_v1  ;;  %v1200_v58 = vand.u32 4294901760, %v1199_v48  ;;  %v4278_v48 = vand.u32 4294901760, %v367_v53  ;;  %v5761_v45 = vand.u32 4294901760, %v4250_v38  ;;  %v5764_v34 = vand.u32 4294901760, %v4264_v11 }
  0x9e   : > { %1128 = vmatpush.msrb.mxu0 %v4153_v23  ;;  %1272 = vmatpush.msrb.mxu2 %v4145_v6 }
  0x9f   : > { %1177 = vmatpush.msrb.mxu1 %v1176_v61  ;;  %1318 = vmatpush.msrb.mxu3 %v4106_v51  ;;  %v4269_v61 = vand.u32 4294901760, %v4242_v28  ;;  %v1229_v46 = vsub.f32 %v4250_v38, %v5761_v45  ;;  %v4307_v47 = vsub.f32 %v367_v53, %v4278_v48  ;;  %v1235_v53 = vsub.f32 %v4264_v11, %v5764_v34 }
  0xa0   : > { %1130 = vmatpush.msrb.mxu0 %v4165_v49  ;;  %1275 = vmatpush.msrb.mxu2 %v4168_v31  ;;  %v4322_v45 = vsub.f32 %v427_v3, %v4292_v2 }
  0xa1   : > { %1183 = vmatpush.msrb.mxu1 %v1182_v26  ;;  %1320 = vmatpush.msrb.mxu3 %v4117_v63  ;;  %5870 = vst [vmem:[#allocation16_spill] sm:$0xff] %v4269_v61  ;;  %v4271_v26 = vand.u32 4294901760, %v429_v42  ;;  %v1148_v56 = vsub.f32 %v4242_v28, %v4269_v61 }
  0xa2   : > { %1132 = vmatpush.msrb.mxu0 %v4179_v8  ;;  %1278 = vmatpush.msrb.mxu2 %v4182_v52  ;;  %v5877_v5 = vand.u32 4294901760, %v4322_v45 }
  0xa3   : > { %1189 = vmatpush.msrb.mxu1 %v1188_v37  ;;  %1322 = vmatpush.msrb.mxu3 %v4139_v43  ;;  %v1206_v37 = vand.u32 4294901760, %v1205_v9  ;;  %v1212_v9 = vand.u32 4294901760, %v1211_v21  ;;  %v1218_v21 = vand.u32 4294901760, %v1217_v54  ;;  %v1224_v54 = vand.u32 4294901760, %v1223_v55 }
  0xa4   : > { %1134 = vmatpush.msrb.mxu0 %v4191_v60  ;;  %1281 = vmatpush.msrb.mxu2 %v4195_v19  ;;  %v4326_v24 = vand.u32 4294901760, %v1148_v56  ;;  %v1230_v55 = vand.u32 4294901760, %v1229_v46  ;;  %v5872_v56 = vand.u32 4294901760, %v4284_v15  ;;  %v1236_v46 = vand.u32 4294901760, %v1235_v53 }
  0xa5   : > { %1195 = vmatpush.msrb.mxu1 %v1194_v4  ;;  %1324 = vmatpush.msrb.mxu3 %v4153_v23  ;;  %v425_v4 = vld [vmem:[%s3538_s18 + $0x3d0] sm:$0xff]  ;;  %v5875_v53 = vand.u32 4294901760, %v4307_v47 }
  0xa6   : > { %1136 = vmatpush.msrb.mxu0 %v4205_v36  ;;  %1284 = vmatpush.msrb.mxu2 %v4209_v27  ;;  %v4309_v12 = vand.u32 4294901760, %v425_v4  ;;  %5871 = vst [vmem:[#allocation17_spill] sm:$0xff] %v4326_v24  ;;  %v1241_v33 = vsub.f32 %v4284_v15, %v5872_v56 }
  0xa7   : > { %1201 = vmatpush.msrb.mxu1 %v1200_v58  ;;  %1326 = vmatpush.msrb.mxu3 %v4165_v49  ;;  %v4300_v58 = vsub.f32 %v429_v42, %v4271_v26  ;;  %v419_v42 = vld [vmem:[%s3538_s18 + $0x3a0] sm:$0xff]  ;;  %v1247_v34 = vsub.f32 %v4307_v47, %v5875_v53 }
  0xa8   : > { %1138 = vmatpush.msrb.mxu0 %v4220_v57  ;;  %1287 = vmatpush.msrb.mxu2 %v4224_v17  ;;  %v4335_v3 = vsub.f32 %v425_v4, %v4309_v12  ;;  %v4348_v4 = vand.u32 4294901760, %v419_v42 }
  0xa9   : > { %1207 = vmatpush.msrb.mxu1 %v1206_v37  ;;  %1328 = vmatpush.msrb.mxu3 %v4179_v8  ;;  %v4315_v37 = vand.u32 4294901760, %v423_v35  ;;  %v5873_v7 = vand.u32 4294901760, %v4300_v58 }
  0xaa   : > { %1140 = vmatpush.msrb.mxu0 %v4232_v32  ;;  %1290 = vmatpush.msrb.mxu2 %v4236_v20  ;;  %v4377_v53 = vsub.f32 %v419_v42, %v4348_v4  ;;  %v5879_v42 = vand.u32 4294901760, %v4335_v3 }
  0xab   : > { %1213 = vmatpush.msrb.mxu1 %v1212_v9  ;;  %1330 = vmatpush.msrb.mxu3 %v4191_v60  ;;  %v4329_v9 = vand.u32 4294901760, %v421_v22  ;;  %v4343_v44 = vsub.f32 %v423_v35, %v4315_v37  ;;  %v1498_v56 = vsub.f32 %v4300_v58, %v5873_v7  ;;  %v1242_v7 = vand.u32 4294901760, %v1241_v33 }
  0xac   : > { %1142 = vmatpush.msrb.mxu0 %v4255_v13  ;;  %1293 = vmatpush.msrb.mxu2 %v4250_v38 }
  0xad   : > { %1219 = vmatpush.msrb.mxu1 %v1218_v21  ;;  %1332 = vmatpush.msrb.mxu3 %v4205_v36  ;;  %v417_v21 = vld [vmem:[%s3538_s18 + $0x390] sm:$0xff]  ;;  %v4356_v35 = vsub.f32 %v421_v22, %v4329_v9  ;;  %v1499_v33 = vand.u32 4294901760, %v1498_v56  ;;  %v5880_v56 = vand.u32 4294901760, %v4343_v44 }
  0xae   : > { %1144 = vmatpush.msrb.mxu0 %v4278_v48  ;;  %1296 = vmatpush.msrb.mxu2 %v4264_v11  ;;  %v4365_v14 = vand.u32 4294901760, %v417_v21 }
  0xaf   : > { %1225 = vmatpush.msrb.mxu1 %v1224_v54  ;;  %1334 = vmatpush.msrb.mxu3 %v4220_v57  ;;  %v415_v54 = vld [vmem:[%s3538_s18 + $0x380] sm:$0xff] }
  0xb0   : > { %1150 = vmatmul.f32.vlgmr.msrb.gmra.mxu0 %v4326_v24  ;;  %1299 = vmatpush.msrb.mxu2 %v4284_v15  ;;  %v4379_v24 = vand.u32 4294901760, %v415_v54  ;;  %v4392_v62 = vsub.f32 %v417_v21, %v4365_v14 }
  0xb1   : > { %1351 = vmatpush.msra.mxu0 %v5874_v30  ;;  %1231 = vmatpush.msrb.mxu1 %v1230_v55  ;;  %v5876_v30 = vand.u32 4294901760, %v4101_v18  ;;  %v1504_v55 = vsub.f32 %v4322_v45, %v5877_v5  ;;  %v411_v18 = vld [vmem:[%s3538_s18 + $0x360] sm:$0xff]  ;;  %v1510_v5 = vsub.f32 %v4335_v3, %v5879_v42 }
  0xb2   : > { %1336 = vmatpush.msrb.mxu3 %v4232_v32  ;;  %1302 = vmatpush.msrb.mxu2 %v4307_v47  ;;  %v4406_v21 = vsub.f32 %v415_v54, %v4379_v24  ;;  %v4419_v54 = vsub.f32 %v413_v25, %v4394_v16 }
  0xb3   : > { %1355 = vmatpush.msra.mxu0 %v5876_v30  ;;  %1237 = vmatpush.msrb.mxu1 %v1236_v46  ;;  %v5878_v46 = vand.u32 4294901760, %v4113_v40  ;;  %v1248_v30 = vand.u32 4294901760, %v1247_v34  ;;  %v1516_v40 = vsub.f32 %v4343_v44, %v5880_v56  ;;  %v5881_v34 = vand.u32 4294901760, %v4125_v39 }
  0xb4   : > { %1338 = vmatpush.msrb.mxu3 %v4255_v13  ;;  %1305 = vmatmul.f32.vlgmr.msrb.gmra.mxu2 %v4242_v28  ;;  %v1505_v42 = vand.u32 4294901760, %v1504_v55  ;;  %v5882_v56 = vand.u32 4294901760, %v4356_v35  ;;  %v5883_v39 = vand.u32 4294901760, %v4130_v50  ;;  %v1511_v55 = vand.u32 4294901760, %v1510_v5 }
  0xb5   : > { %1359 = vmatpush.msra.mxu0 %v5878_v46  ;;  %1455 = vmatpush.msra.mxu2 %v4271_v26  ;;  %v409_v46 = vld [vmem:[%s3538_s18 + $0x350] sm:$0xff]  ;;  %v5884_v50 = vand.u32 4294901760, %v4377_v53  ;;  %v5779_v5 = vand.u32 4294901760, %v4406_v21 }
  0xb6   : > { %1243 = vmatpush.msrb.mxu1 %v1242_v7  ;;  %1340 = vmatpush.msrb.mxu3 %v4278_v48  ;;  %v4408_v7 = vand.u32 4294901760, %v411_v18  ;;  %v1522_v28 = vsub.f32 %v4356_v35, %v5882_v56  ;;  %v4421_v22 = vand.u32 4294901760, %v409_v46 }
  0xb7   : > { %1344 = vmatmul.f32.vlgmr.msrb.gmra.mxu3 %v4269_v61  ;;  %1363 = vmatpush.msra.mxu0 %v5881_v34  ;;  %v407_v61 = vld [vmem:[%s3538_s18 + $0x340] sm:$0xff]  ;;  %v5778_v34 = vand.u32 4294901760, %v4392_v62 }
  0xb8   : > { %1457 = vmatpush.msra.mxu2 %v4292_v2  ;;  %1500 = vmatpush.msra.mxu3 %v1499_v33  ;;  %v1517_v33 = vand.u32 4294901760, %v1516_v40  ;;  %v4432_v25 = vsub.f32 %v411_v18, %v4408_v7  ;;  %v4434_v56 = vand.u32 4294901760, %v407_v61  ;;  %v1523_v40 = vand.u32 4294901760, %v1522_v28  ;;  %v300_v18 = vld [vmem:[%s3548_s26 + $0x18] sm:$0xff] }
  0xb9   : > { %1249 = vmatpush.msrb.mxu1 %v1248_v30  ;;  %1367 = vmatpush.msra.mxu0 %v5883_v39  ;;  %v1528_v30 = vsub.f32 %v4377_v53, %v5884_v50  ;;  %v5885_v39 = vand.u32 4294901760, %v4145_v6  ;;  %v4447_v50 = vand.u32 4294901760, %v405_v29  ;;  %v403_v6 = vld [vmem:[%s3538_s18 + $0x320] sm:$0xff]  ;;  %v1540_v28 = vsub.f32 %v4406_v21, %v5779_v5 }
  0xba   : > { %1251 = vmatmul.f32.vlgmr.msrb.gmra.mxu1 %v4214_v10  ;;  %1459 = vmatpush.msra.mxu2 %v4309_v12 }
  0xbb   : > { %1418 = vmatpush.msra.mxu1 %v4071_v41  ;;  %1506 = vmatpush.msra.mxu3 %v1505_v42  ;;  %v1534_v41 = vsub.f32 %v4392_v62, %v5778_v34  ;;  %v4445_v42 = vsub.f32 %v409_v46, %v4421_v22  ;;  %v401_v34 = vld [vmem:[%s3538_s18 + $0x310] sm:$0xff]  ;;  %v4474_v5 = vsub.f32 %v405_v29, %v4447_v50  ;;  %v399_v46 = vld [vmem:[%s3538_s18 + $0x300] sm:$0xff] }
  0xbc   : > { %1371 = vmatpush.msra.mxu0 %v5885_v39  ;;  %1461 = vmatpush.msra.mxu2 %v4315_v37  ;;  %v5886_v39 = vand.u32 4294901760, %v4168_v31  ;;  %v5887_v31 = vand.u32 4294901760, %v4182_v52  ;;  %v5889_v52 = vand.u32 4294901760, %v4195_v19 }
  0xbd   : > { %1420 = vmatpush.msra.mxu1 %v4079_v59  ;;  %1512 = vmatpush.msra.mxu3 %v1511_v55  ;;  %v1529_v59 = vand.u32 4294901760, %v1528_v30  ;;  %v4459_v55 = vsub.f32 %v407_v61, %v4434_v56  ;;  %v5888_v30 = vand.u32 4294901760, %v4419_v54  ;;  %v5892_v61 = vand.u32 4294901760, %v4209_v27 }
  0xbe   : > { %1375 = vmatpush.msra.mxu0 %v5886_v39  ;;  %1463 = vmatpush.msra.mxu2 %v4329_v9  ;;  %v5894_v27 = vand.u32 4294901760, %v4224_v17 }
  0xbf   : > { %1422 = vmatpush.msra.mxu1 %v4087_v0  ;;  %1518 = vmatpush.msra.mxu3 %v1517_v33  ;;  %v4466_v0 = vand.u32 4294901760, %v403_v6  ;;  %v1535_v33 = vand.u32 4294901760, %v1534_v41  ;;  %v1546_v39 = vsub.f32 %v4419_v54, %v5888_v30  ;;  %v5891_v41 = vand.u32 4294901760, %v4432_v25 }
  0xc0   : > { %1379 = vmatpush.msra.mxu0 %v5887_v31  ;;  %1465 = vmatpush.msra.mxu2 %v4348_v4  ;;  %v4480_v31 = vand.u32 4294901760, %v401_v34  ;;  %v1563_v29 = vand.u32 4294901760, %v4459_v55 }
  0xc1   : > { %1424 = vmatpush.msra.mxu1 %v4098_v1  ;;  %1524 = vmatpush.msra.mxu3 %v1523_v40  ;;  %v4482_v1 = vand.u32 4294901760, %v300_v18  ;;  %v1541_v40 = vand.u32 4294901760, %v1540_v28  ;;  %v1552_v30 = vsub.f32 %v4432_v25, %v5891_v41  ;;  %v4493_v19 = vsub.f32 %v403_v6, %v4466_v0 }
  0xc2   : > { %1383 = vmatpush.msra.mxu0 %v5889_v52  ;;  %1467 = vmatpush.msra.mxu2 %v4365_v14  ;;  %v4495_v52 = vand.u32 4294901760, %v399_v46  ;;  %v1569_v41 = vand.u32 4294901760, %v4474_v5  ;;  %v4506_v6 = vsub.f32 %v401_v34, %v4480_v31 }
  0xc3   : > { %5890 = vst [vmem:[#allocation18_spill] sm:$0xff] %v4482_v1  ;;  %1426 = vmatpush.msra.mxu1 %v4106_v51  ;;  %1530 = vmatpush.msra.mxu3 %v1529_v59  ;;  %v1547_v51 = vand.u32 4294901760, %v1546_v39  ;;  %v5893_v59 = vand.u32 4294901760, %v4445_v42  ;;  %v5896_v39 = vand.u32 4294901760, %v4236_v20  ;;  %v1575_v17 = vand.u32 4294901760, %v4493_v19 }
  0xc4   : > { %1387 = vmatpush.msra.mxu0 %v5892_v61  ;;  %1469 = vmatpush.msra.mxu2 %v4379_v24  ;;  %v4509_v61 = vsub.f32 %v300_v18, %v4482_v1  ;;  %v4520_v34 = vsub.f32 %v399_v46, %v4495_v52  ;;  %v1570_v18 = vsub.f32 %v4474_v5, %v1569_v41  ;;  %v1581_v20 = vand.u32 4294901760, %v4506_v6 }
  0xc5   : > { %1428 = vmatpush.msra.mxu1 %v4117_v63  ;;  %1536 = vmatpush.msra.mxu3 %v1535_v33  ;;  %v1558_v28 = vsub.f32 %v4445_v42, %v5893_v59  ;;  %v1553_v63 = vand.u32 4294901760, %v1552_v30  ;;  %v1564_v33 = vsub.f32 %v4459_v55, %v1563_v29  ;;  %v5899_v46 = vand.u32 4294901760, %v4264_v11 }
  0xc6   : > { %1391 = vmatpush.msra.mxu0 %v5894_v27  ;;  %1471 = vmatpush.msra.mxu2 %v4394_v16  ;;  %5895 = vst [vmem:[#allocation19_spill] sm:$0xff] %v4509_v61  ;;  %v4531_v30 = vand.u32 4294901760, %v4509_v61  ;;  %v1571_v59 = vand.u32 4294901760, %v1570_v18  ;;  %v5901_v27 = vand.u32 4294901760, %v4307_v47 }
  0xc7   : > { %1430 = vmatpush.msra.mxu1 %v4139_v43  ;;  %1542 = vmatpush.msra.mxu3 %v1541_v40  ;;  %v1559_v43 = vand.u32 4294901760, %v1558_v28  ;;  %v5897_v40 = vand.u32 4294901760, %v4250_v38  ;;  %v1576_v38 = vsub.f32 %v4493_v19, %v1575_v17  ;;  %v5900_v28 = vand.u32 4294901760, %v4284_v15 }
  0xc8   : > { %1395 = vmatpush.msra.mxu0 %v5896_v39  ;;  %1473 = vmatpush.msra.mxu2 %v4408_v7  ;;  %5898 = vst [vmem:[#allocation20_spill] sm:$0xff] %v4531_v30  ;;  %v1489_v11 = vsub.f32 %v4509_v61, %v4531_v30 }
  0xc9   : > { %1432 = vmatpush.msra.mxu1 %v4153_v23  ;;  %1548 = vmatpush.msra.mxu3 %v1547_v51  ;;  %v1565_v23 = vand.u32 4294901760, %v1564_v33  ;;  %v1587_v51 = vand.u32 4294901760, %v4520_v34  ;;  %v318_v33 = vld [vmem:[%s3538_s18 + $0x78] sm:$0xff] }
  0xca   : > { %1399 = vmatpush.msra.mxu0 %v5897_v40  ;;  %1475 = vmatpush.msra.mxu2 %v4421_v22  ;;  %v4709_v18 = vand.u32 4294901760, %v318_v33 }
  0xcb   : > { %1434 = vmatpush.msra.mxu1 %v4165_v49  ;;  %1554 = vmatpush.msra.mxu3 %v1553_v63  ;;  %v1582_v49 = vsub.f32 %v4506_v6, %v1581_v20  ;;  %v1588_v15 = vsub.f32 %v4520_v34, %v1587_v51 }
  0xcc   : > { %1403 = vmatpush.msra.mxu0 %v5899_v46  ;;  %1477 = vmatpush.msra.mxu2 %v4434_v56 }
  0xcd   : > { %1436 = vmatpush.msra.mxu1 %v4179_v8  ;;  %1560 = vmatpush.msra.mxu3 %v1559_v43  ;;  %v1577_v8 = vand.u32 4294901760, %v1576_v38  ;;  %v1583_v63 = vand.u32 4294901760, %v1582_v49  ;;  %v1589_v47 = vand.u32 4294901760, %v1588_v15  ;;  %v316_v43 = vld [vmem:[%s3538_s18 + $0x68] sm:$0xff]  ;;  %v314_v38 = vld [vmem:[%s3538_s18 + $0x58] sm:$0xff] }
  0xce   : > { %1407 = vmatpush.msra.mxu0 %v5900_v28  ;;  %1479 = vmatpush.msra.mxu2 %v4447_v50  ;;  %v4744_v15 = vand.u32 4294901760, %v314_v38 }
  0xcf   : > { %1438 = vmatpush.msra.mxu1 %v4191_v60  ;;  %1566 = vmatpush.msra.mxu3 %v1565_v23  ;;  %v4560_v60 = vand.u32 4294901760, %v1489_v11  ;;  %v4737_v11 = vsub.f32 %v318_v33, %v4709_v18 }
  0xd0   : > { %1411 = vmatpush.msra.mxu0 %v5901_v27  ;;  %1481 = vmatpush.msra.mxu2 %v4466_v0 }
  0xd1   : > { %1440 = vmatpush.msra.mxu1 %v4205_v36  ;;  %1572 = vmatpush.msra.mxu3 %v1571_v59  ;;  %5902 = vst [vmem:[#allocation21_spill] sm:$0xff] %v4560_v60  ;;  %v5903_v36 = vand.u32 4294901760, %v4300_v58 }
  0xd2   : > { %1413 = vmatmul.f32.vlgmr.msra.gmra.mxu0 %v4214_v10  ;;  %1483 = vmatpush.msra.mxu2 %v4480_v31 }
  0xd3   : > { %1598 = vmatpush.msrb.mxu0 %v4300_v58  ;;  %1442 = vmatpush.msra.mxu1 %v4220_v57  ;;  %v5904_v57 = vand.u32 4294901760, %v4322_v45  ;;  %v332_v58 = vld [vmem:[%s3538_s18 + $0xe8] sm:$0xff] }
  0xd4   : > { %1578 = vmatpush.msra.mxu3 %v1577_v8  ;;  %1485 = vmatpush.msra.mxu2 %v4495_v52 }
  0xd5   : > { %1601 = vmatpush.msrb.mxu0 %v4322_v45  ;;  %1444 = vmatpush.msra.mxu1 %v4232_v32  ;;  %v5905_v32 = vand.u32 4294901760, %v4335_v3  ;;  %v5906_v45 = vand.u32 4294901760, %v4343_v44 }
  0xd6   : > { %1584 = vmatpush.msra.mxu3 %v1583_v63  ;;  %1491 = vmatmul.f32.vlgmr.msra.gmra.mxu2 %v4560_v60 }
  0xd7   : > { %1604 = vmatpush.msrb.mxu0 %v4335_v3  ;;  %1692 = vmatpush.msrb.mxu2 %v5903_v36  ;;  %v4629_v3 = vand.u32 4294901760, %v332_v58  ;;  %v310_v36 = vld [vmem:[%s3538_s18 + $0x38] sm:$0xff] }
  0xd8   : > { %1446 = vmatpush.msra.mxu1 %v4255_v13  ;;  %1590 = vmatpush.msra.mxu3 %v1589_v47  ;;  %v5907_v13 = vand.u32 4294901760, %v4356_v35 }
  0xd9   : > { %1592 = vmatmul.f32.vlgmr.msra.gmra.mxu3 %v4482_v1  ;;  %1607 = vmatpush.msrb.mxu0 %v4343_v44  ;;  %v5909_v44 = vand.u32 4294901760, %v4392_v62 }
  0xda   : > { %1696 = vmatpush.msrb.mxu2 %v5904_v57  ;;  %1759 = vmatpush.msrb.mxu3 %v4271_v26 }
  0xdb   : > { %1448 = vmatpush.msra.mxu1 %v4278_v48  ;;  %1610 = vmatpush.msrb.mxu0 %v4356_v35  ;;  %v5912_v48 = vand.u32 4294901760, %v4432_v25 }
  0xdc   : > { %1450 = vmatmul.f32.vlgmr.msra.gmra.mxu1 %v4214_v10  ;;  %1700 = vmatpush.msrb.mxu2 %v5905_v32  ;;  %v342_v10 = vld [vmem:[%s3538_s18 + $0x138] sm:$0xff] }
  0xdd   : > { %1651 = vmatpush.msrb.mxu1 %v4271_v26  ;;  %1761 = vmatpush.msrb.mxu3 %v4292_v2  ;;  %v5908_v26 = vand.u32 4294901760, %v4377_v53 }
  0xde   : > { %1613 = vmatpush.msrb.mxu0 %v4377_v53  ;;  %1704 = vmatpush.msrb.mxu2 %v5906_v45 }
  0xdf   : > { %1653 = vmatpush.msrb.mxu1 %v4292_v2  ;;  %1763 = vmatpush.msrb.mxu3 %v4309_v12  ;;  %v5911_v2 = vand.u32 4294901760, %v4419_v54 }
  0xe0   : > { %1616 = vmatpush.msrb.mxu0 %v4392_v62  ;;  %1708 = vmatpush.msrb.mxu2 %v5907_v13  ;;  %v334_v62 = vld [vmem:[%s3538_s18 + $0xf8] sm:$0xff] }
  0xe1   : > { %1655 = vmatpush.msrb.mxu1 %v4309_v12  ;;  %1765 = vmatpush.msrb.mxu3 %v4315_v37  ;;  %v5910_v12 = vand.u32 4294901760, %v4406_v21 }
  0xe2   : > { %1619 = vmatpush.msrb.mxu0 %v4406_v21  ;;  %1712 = vmatpush.msrb.mxu2 %v5908_v26  ;;  %v4651_v21 = vsub.f32 %v332_v58, %v4629_v3  ;;  %v5782_v26 = vand.u32 4294901760, %v4737_v11 }
  0xe3   : > { %1657 = vmatpush.msrb.mxu1 %v4315_v37  ;;  %1767 = vmatpush.msrb.mxu3 %v4329_v9  ;;  %v4621_v37 = vand.u32 4294901760, %v334_v62 }
  0xe4   : > { %1622 = vmatpush.msrb.mxu0 %v4419_v54  ;;  %1716 = vmatpush.msrb.mxu2 %v5909_v44  ;;  %v308_v44 = vld [vmem:[%s3538_s18 + $0x28] sm:$0xff] }
  0xe5   : > { %1659 = vmatpush.msrb.mxu1 %v4329_v9  ;;  %1769 = vmatpush.msrb.mxu3 %v4348_v4  ;;  %v330_v9 = vld [vmem:[%s3538_s18 + $0xd8] sm:$0xff]  ;;  %v4640_v35 = vsub.f32 %v334_v62, %v4621_v37  ;;  %v4768_v62 = vand.u32 4294901760, %v310_v36 }
  0xe6   : > { %1625 = vmatpush.msrb.mxu0 %v4432_v25  ;;  %1720 = vmatpush.msrb.mxu2 %v5910_v12  ;;  %v322_v25 = vld [vmem:[%s3538_s18 + $0x98] sm:$0xff] }
  0xe7   : > { %1661 = vmatpush.msrb.mxu1 %v4348_v4  ;;  %1771 = vmatpush.msrb.mxu3 %v4365_v14  ;;  %v4637_v4 = vand.u32 4294901760, %v330_v9 }
  0xe8   : > { %1628 = vmatpush.msrb.mxu0 %v4445_v42  ;;  %1724 = vmatpush.msrb.mxu2 %v5911_v2 }
  0xe9   : > { %1663 = vmatpush.msrb.mxu1 %v4365_v14  ;;  %1773 = vmatpush.msrb.mxu3 %v4379_v24  ;;  %v5913_v14 = vand.u32 4294901760, %v4445_v42  ;;  %v5793_v42 = vand.u32 4294901760, %v4651_v21 }
  0xea   : > { %1631 = vmatpush.msrb.mxu0 %v4459_v55  ;;  %1728 = vmatpush.msrb.mxu2 %v5912_v48  ;;  %v4771_v48 = vsub.f32 %v314_v38, %v4744_v15 }
  0xeb   : > { %1665 = vmatpush.msrb.mxu1 %v4379_v24  ;;  %1775 = vmatpush.msrb.mxu3 %v4394_v16  ;;  %v328_v24 = vld [vmem:[%s3538_s18 + $0xc8] sm:$0xff] }
  0xec   : > { %1634 = vmatpush.msrb.mxu0 %v4474_v5  ;;  %1732 = vmatpush.msrb.mxu2 %v5913_v14  ;;  %v4648_v53 = vand.u32 4294901760, %v328_v24  ;;  %v4663_v5 = vsub.f32 %v330_v9, %v4637_v4  ;;  %v306_v14 = vld [vmem:[%s3538_s18 + $0x18] sm:$0xff] }
  0xed   : > { %1667 = vmatpush.msrb.mxu1 %v4394_v16  ;;  %1777 = vmatpush.msrb.mxu3 %v4408_v7  ;;  %v326_v16 = vld [vmem:[%s3538_s18 + $0xb8] sm:$0xff] }
  0xee   : > { %1637 = vmatpush.msrb.mxu0 %v4493_v19  ;;  %1736 = vmatpush.msrb.mxu2 %v1563_v29  ;;  %v4659_v54 = vand.u32 4294901760, %v326_v16  ;;  %v4675_v55 = vsub.f32 %v328_v24, %v4648_v53  ;;  %v320_v29 = vld [vmem:[%s3538_s18 + $0x88] sm:$0xff]  ;;  %v4686_v19 = vand.u32 4294901760, %v322_v25 }
  0xef   : > { %1669 = vmatpush.msrb.mxu1 %v4408_v7  ;;  %1779 = vmatpush.msrb.mxu3 %v4421_v22  ;;  %v324_v7 = vld [vmem:[%s3538_s18 + $0xa8] sm:$0xff]  ;;  %v4700_v39 = vand.u32 4294901760, %v320_v29 }
  0xf0   : > { %1640 = vmatpush.msrb.mxu0 %v4506_v6  ;;  %1740 = vmatpush.msrb.mxu2 %v1569_v41  ;;  %v5792_v41 = vand.u32 4294901760, %v4663_v5  ;;  %v4690_v6 = vsub.f32 %v326_v16, %v4659_v54  ;;  %v4718_v46 = vsub.f32 %v322_v25, %v4686_v19  ;;  %v4781_v16 = vand.u32 4294901760, %v308_v44  ;;  %v366_v25 = vld [vmem:[%s3538_s18 + $0x1f8] sm:$0xff] }
  0xf1   : > { %1671 = vmatpush.msrb.mxu1 %v4421_v22  ;;  %1781 = vmatpush.msrb.mxu3 %v4434_v56  ;;  %v1838_v22 = vand.u32 4294901760, %v4640_v35  ;;  %v4732_v49 = vsub.f32 %v320_v29, %v4700_v39  ;;  %v1887_v29 = vsub.f32 %v4737_v11, %v5782_v26  ;;  %v4805_v38 = vand.u32 4294901760, %v366_v25  ;;  %v358_v26 = vld [vmem:[%s3538_s18 + $0x1b8] sm:$0xff] }
  0xf2   : > { %1643 = vmatpush.msrb.mxu0 %v4520_v34  ;;  %1744 = vmatpush.msrb.mxu2 %v1575_v17  ;;  %v5790_v17 = vand.u32 4294901760, %v4675_v55  ;;  %v5788_v23 = vand.u32 4294901760, %v4690_v6  ;;  %v5785_v63 = vand.u32 4294901760, %v4718_v46 }
  0xf3   : > { %1673 = vmatpush.msrb.mxu1 %v4434_v56  ;;  %1783 = vmatpush.msrb.mxu3 %v4447_v50  ;;  %v4671_v56 = vand.u32 4294901760, %v324_v7  ;;  %v5784_v13 = vand.u32 4294901760, %v4732_v49 }
  0xf4   : > { %1646 = vmatmul.f32.vlgmr.msrb.gmra.mxu0 %v4509_v61  ;;  %1748 = vmatpush.msrb.mxu2 %v1581_v20  ;;  %v1851_v20 = vsub.f32 %v4663_v5, %v5792_v41  ;;  %v1857_v59 = vsub.f32 %v4675_v55, %v5790_v17  ;;  %v1863_v8 = vsub.f32 %v4690_v6, %v5788_v23 }
  0xf5   : > { %1796 = vmatpush.msra.mxu0 %v4621_v37  ;;  %1675 = vmatpush.msrb.mxu1 %v4447_v50  ;;  %v1839_v50 = vsub.f32 %v4640_v35, %v1838_v22  ;;  %v4704_v34 = vsub.f32 %v324_v7, %v4671_v56  ;;  %v1875_v2 = vsub.f32 %v4718_v46, %v5785_v63  ;;  %v356_v63 = vld [vmem:[%s3538_s18 + $0x1a8] sm:$0xff] }
  0xf6   : > { %1785 = vmatpush.msrb.mxu3 %v4466_v0  ;;  %1752 = vmatpush.msrb.mxu2 %v1587_v51  ;;  %v1852_v27 = vand.u32 4294901760, %v1851_v20  ;;  %v1858_v57 = vand.u32 4294901760, %v1857_v59  ;;  %v1864_v12 = vand.u32 4294901760, %v1863_v8  ;;  %v1881_v24 = vsub.f32 %v4732_v49, %v5784_v13 }
  0xf7   : > { %1798 = vmatpush.msra.mxu0 %v4629_v3  ;;  %1677 = vmatpush.msrb.mxu1 %v4466_v0  ;;  %v1845_v0 = vsub.f32 %v4651_v21, %v5793_v42  ;;  %v1840_v40 = vand.u32 4294901760, %v1839_v50  ;;  %v5787_v28 = vand.u32 4294901760, %v4704_v34  ;;  %v304_v50 = vld [vmem:[%s3538_s18 + $0x8] sm:$0xff]  ;;  %v1876_v33 = vand.u32 4294901760, %v1875_v2 }
  0xf8   : > { %1787 = vmatpush.msrb.mxu3 %v4480_v31  ;;  %1754 = vmatmul.f32.vlgmr.msrb.gmra.mxu2 %v4482_v1  ;;  %v1882_v59 = vand.u32 4294901760, %v1881_v24  ;;  %v4813_v8 = vsub.f32 %v308_v44, %v4781_v16 }
  0xf9   : > { %1800 = vmatpush.msra.mxu0 %v4637_v4  ;;  %1939 = vmatpush.msra.mxu2 %v4640_v35  ;;  %v1846_v51 = vand.u32 4294901760, %v1845_v0  ;;  %v1869_v32 = vsub.f32 %v4704_v34, %v5787_v28  ;;  %v4794_v0 = vand.u32 4294901760, %v306_v14  ;;  %v5915_v35 = vand.u32 4294901760, %v4651_v21 }
  0xfa   : > { %1679 = vmatpush.msrb.mxu1 %v4480_v31  ;;  %1789 = vmatpush.msrb.mxu3 %v4495_v52  ;;  %v4722_v31 = vand.u32 4294901760, %v316_v43 }
  0xfb   : > { %1791 = vmatmul.f32.vlgmr.msrb.gmra.mxu3 %v4482_v1  ;;  %1802 = vmatpush.msra.mxu0 %v4648_v53  ;;  %v1870_v9 = vand.u32 4294901760, %v1869_v32  ;;  %v4824_v2 = vsub.f32 %v306_v14, %v4794_v0  ;;  %v5789_v14 = vand.u32 4294901760, %v4813_v8 }
  0xfc   : > { %1942 = vmatpush.msra.mxu2 %v4651_v21  ;;  %1992 = vmatpush.msra.mxu3 %v4621_v37  ;;  %v4750_v47 = vsub.f32 %v316_v43, %v4722_v31  ;;  %v5780_v43 = vand.u32 4294901760, %v4771_v48 }
  0xfd   : > { %1681 = vmatpush.msrb.mxu1 %v4495_v52  ;;  %1804 = vmatpush.msra.mxu0 %v4659_v54  ;;  %v312_v52 = vld [vmem:[%s3538_s18 + $0x48] sm:$0xff] }
  0xfe   : > { %1685 = vmatmul.f32.vlgmr.msrb.gmra.mxu1 %v4531_v30  ;;  %1945 = vmatpush.msra.mxu2 %v4663_v5  ;;  %v4757_v45 = vand.u32 4294901760, %v312_v52  ;;  %v5781_v58 = vand.u32 4294901760, %v4750_v47  ;;  %v1899_v32 = vsub.f32 %v4771_v48, %v5780_v43 }
  0xff   : > { %1841 = vmatpush.msra.mxu1 %v1840_v40  ;;  %1994 = vmatpush.msra.mxu3 %v4629_v3  ;;  %v4798_v40 = vsub.f32 %v310_v36, %v4768_v62  ;;  %v1888_v36 = vand.u32 4294901760, %v1887_v29  ;;  %v4832_v29 = vsub.f32 %v366_v25, %v4805_v38 }
 0x100   : > { %1806 = vmatpush.msra.mxu0 %v4671_v56  ;;  %1948 = vmatpush.msra.mxu2 %v4675_v55  ;;  %v4784_v7 = vsub.f32 %v312_v52, %v4757_v45  ;;  %v1893_v20 = vsub.f32 %v4750_v47, %v5781_v58  ;;  %v4809_v52 = vand.u32 4294901760, %v304_v50 }
 0x101   : > { %1847 = vmatpush.msra.mxu1 %v1846_v51  ;;  %1996 = vmatpush.msra.mxu3 %v4637_v4  ;;  %v364_v51 = vld [vmem:[%s3538_s18 + $0x1e8] sm:$0xff]  ;;  %v5794_v13 = vand.u32 4294901760, %v4832_v29 }
 0x102   : > { %1808 = vmatpush.msra.mxu0 %v4686_v19  ;;  %1951 = vmatpush.msra.mxu2 %v4690_v6  ;;  %v4826_v44 = vand.u32 4294901760, %v364_v51  ;;  %v1894_v24 = vand.u32 4294901760, %v1893_v20  ;;  %v4840_v43 = vsub.f32 %v304_v50, %v4809_v52  ;;  %v1900_v20 = vand.u32 4294901760, %v1899_v32 }
 0x103   : > { %1853 = vmatpush.msra.mxu1 %v1852_v27  ;;  %1998 = vmatpush.msra.mxu3 %v4648_v53  ;;  %v5783_v27 = vand.u32 4294901760, %v4784_v7  ;;  %v5791_v50 = vand.u32 4294901760, %v4824_v2 }
 0x104   : > { %1810 = vmatpush.msra.mxu0 %v4700_v39  ;;  %1954 = vmatpush.msra.mxu2 %v4704_v34 }
 0x105   : > { %1859 = vmatpush.msra.mxu1 %v1858_v57  ;;  %2000 = vmatpush.msra.mxu3 %v4659_v54  ;;  %v362_v57 = vld [vmem:[%s3538_s18 + $0x1d8] sm:$0xff] }
 0x106   : > { %1812 = vmatpush.msra.mxu0 %v4709_v18  ;;  %1957 = vmatpush.msra.mxu2 %v4718_v46  ;;  %v4842_v58 = vand.u32 4294901760, %v362_v57 }
 0x107   : > { %1865 = vmatpush.msra.mxu1 %v1864_v12  ;;  %2002 = vmatpush.msra.mxu3 %v4671_v56  ;;  %v5786_v12 = vand.u32 4294901760, %v4798_v40 }
 0x108   : > { %1814 = vmatpush.msra.mxu0 %v4722_v31  ;;  %1960 = vmatpush.msra.mxu2 %v4732_v49  ;;  %v4869_v28 = vsub.f32 %v362_v57, %v4842_v58  ;;  %v4882_v57 = vand.u32 4294901760, %v356_v63 }
 0x109   : > { %1871 = vmatpush.msra.mxu1 %v1870_v9  ;;  %2004 = vmatpush.msra.mxu3 %v4686_v19  ;;  %v360_v9 = vld [vmem:[%s3538_s18 + $0x1c8] sm:$0xff] }
 0x10a   : > { %1816 = vmatpush.msra.mxu0 %v4744_v15  ;;  %1963 = vmatpush.msra.mxu2 %v4737_v11  ;;  %v4847_v25 = vand.u32 4294901760, %v360_v9  ;;  %v4910_v42 = vsub.f32 %v356_v63, %v4882_v57 }
 0x10b   : > { %1877 = vmatpush.msra.mxu1 %v1876_v33  ;;  %2006 = vmatpush.msra.mxu3 %v4700_v39  ;;  %v1905_v33 = vsub.f32 %v4784_v7, %v5783_v27  ;;  %v4855_v27 = vsub.f32 %v364_v51, %v4826_v44  ;;  %v5795_v51 = vand.u32 4294901760, %v4840_v43 }
 0x10c   : > { %1818 = vmatpush.msra.mxu0 %v4757_v45  ;;  %1966 = vmatpush.msra.mxu2 %v4750_v47  ;;  %v4874_v23 = vsub.f32 %v360_v9, %v4847_v25  ;;  %v2180_v9 = vsub.f32 %v4832_v29, %v5794_v13 }
 0x10d   : > { %1883 = vmatpush.msra.mxu1 %v1882_v59  ;;  %2008 = vmatpush.msra.mxu3 %v4709_v18  ;;  %v1911_v59 = vsub.f32 %v4798_v40, %v5786_v12  ;;  %v1906_v32 = vand.u32 4294901760, %v1905_v33  ;;  %v1917_v12 = vsub.f32 %v4813_v8, %v5789_v14  ;;  %v1923_v14 = vsub.f32 %v4824_v2, %v5791_v50 }
 0x10e   : > { %1820 = vmatpush.msra.mxu0 %v4768_v62  ;;  %1969 = vmatpush.msra.mxu2 %v4771_v48  ;;  %v1929_v41 = vsub.f32 %v4840_v43, %v5795_v51  ;;  %v5914_v13 = vand.u32 4294901760, %v4855_v27 }
 0x10f   : > { %1889 = vmatpush.msra.mxu1 %v1888_v36  ;;  %2010 = vmatpush.msra.mxu3 %v4722_v31  ;;  %v4860_v36 = vand.u32 4294901760, %v358_v26  ;;  %v1912_v33 = vand.u32 4294901760, %v1911_v59  ;;  %v352_v59 = vld [vmem:[%s3538_s18 + $0x188] sm:$0xff]  ;;  %v1918_v50 = vand.u32 4294901760, %v1917_v12  ;;  %v1924_v12 = vand.u32 4294901760, %v1923_v14 }
 0x110   : > { %1822 = vmatpush.msra.mxu0 %v4781_v16  ;;  %1972 = vmatpush.msra.mxu2 %v4784_v7  ;;  %v2186_v51 = vsub.f32 %v4855_v27, %v5914_v13  ;;  %v4912_v30 = vand.u32 4294901760, %v352_v59  ;;  %v1930_v14 = vand.u32 4294901760, %v1929_v41  ;;  %v5916_v13 = vand.u32 4294901760, %v4869_v28  ;;  %v346_v41 = vld [vmem:[%s3538_s18 + $0x158] sm:$0xff] }
 0x111   : > { %1895 = vmatpush.msra.mxu1 %v1894_v24  ;;  %2012 = vmatpush.msra.mxu3 %v4744_v15  ;;  %v354_v24 = vld [vmem:[%s3538_s18 + $0x198] sm:$0xff]  ;;  %v4953_v60 = vand.u32 4294901760, %v346_v41 }
 0x112   : > { %1824 = vmatpush.msra.mxu0 %v4794_v0  ;;  %1975 = vmatpush.msra.mxu2 %v4798_v40  ;;  %v4898_v17 = vand.u32 4294901760, %v354_v24  ;;  %v2192_v63 = vsub.f32 %v4869_v28, %v5916_v13  ;;  %v2187_v13 = vand.u32 4294901760, %v2186_v51 }
 0x113   : > { %1901 = vmatpush.msra.mxu1 %v1900_v20  ;;  %2014 = vmatpush.msra.mxu3 %v4757_v45  ;;  %v4890_v20 = vsub.f32 %v358_v26, %v4860_v36  ;;  %v348_v26 = vld [vmem:[%s3538_s18 + $0x168] sm:$0xff] }
 0x114   : > { %1826 = vmatpush.msra.mxu0 %v4809_v52  ;;  %1978 = vmatpush.msra.mxu2 %v4813_v8  ;;  %v4924_v61 = vsub.f32 %v354_v24, %v4898_v17  ;;  %v4938_v24 = vsub.f32 %v352_v59, %v4912_v30  ;;  %v4940_v1 = vand.u32 4294901760, %v348_v26  ;;  %v2193_v51 = vand.u32 4294901760, %v2192_v63 }
 0x115   : > { %1907 = vmatpush.msra.mxu1 %v1906_v32  ;;  %2016 = vmatpush.msra.mxu3 %v4768_v62  ;;  %v350_v32 = vld [vmem:[%s3538_s18 + $0x178] sm:$0xff] }
 0x116   : > { %2033 = vmatpush.msrb.mxu0 %v1838_v22  ;;  %1981 = vmatpush.msra.mxu2 %v4824_v2  ;;  %v2181_v22 = vand.u32 4294901760, %v2180_v9  ;;  %v4926_v21 = vand.u32 4294901760, %v350_v32  ;;  %v4965_v63 = vsub.f32 %v348_v26, %v4940_v1  ;;  %v4978_v26 = vsub.f32 %v346_v41, %v4953_v60 }
 0x117   : > { %1913 = vmatpush.msra.mxu1 %v1912_v33  ;;  %2018 = vmatpush.msra.mxu3 %v4781_v16  ;;  %v2215_v33 = vand.u32 4294901760, %v4924_v61 }
 0x118   : > { %2037 = vmatpush.msrb.mxu0 %v5915_v35  ;;  %1984 = vmatpush.msra.mxu2 %v4840_v43  ;;  %v5917_v35 = vand.u32 4294901760, %v4663_v5  ;;  %v5919_v5 = vand.u32 4294901760, %v4675_v55  ;;  %v4951_v59 = vsub.f32 %v350_v32, %v4926_v21  ;;  %v5921_v55 = vand.u32 4294901760, %v4690_v6 }
 0x119   : > { %1919 = vmatpush.msra.mxu1 %v1918_v50  ;;  %2020 = vmatpush.msra.mxu3 %v4794_v0  ;;  %v5918_v50 = vand.u32 4294901760, %v4874_v23  ;;  %v2221_v32 = vand.u32 4294901760, %v4938_v24  ;;  %v5923_v6 = vand.u32 4294901760, %v4704_v34  ;;  %v340_v34 = vld [vmem:[%s3538_s18 + $0x128] sm:$0xff]  ;;  %v2233_v41 = vand.u32 4294901760, %v4965_v63 }
 0x11a   : > { %2041 = vmatpush.msrb.mxu0 %v5917_v35  ;;  %2137 = vmatpush.msrb.mxu2 %v4805_v38  ;;  %v5920_v35 = vand.u32 4294901760, %v4890_v20 }
 0x11b   : > { %v2198_v9 = vsub.f32 %v4874_v23, %v5918_v50  ;;  %1925 = vmatpush.msra.mxu1 %v1924_v12  ;;  %2022 = vmatpush.msra.mxu3 %v4809_v52  ;;  %v344_v50 = vld [vmem:[%s3538_s18 + $0x148] sm:$0xff] }
 0x11c   : > { %2045 = vmatpush.msrb.mxu0 %v5919_v5  ;;  %2139 = vmatpush.msrb.mxu2 %v4826_v44  ;;  %v2204_v12 = vsub.f32 %v4890_v20, %v5920_v35  ;;  %v4967_v35 = vand.u32 4294901760, %v344_v50 }
 0x11d   : > { %2182 = vmatpush.msrb.mxu3 %v2181_v22  ;;  %1931 = vmatpush.msra.mxu1 %v1930_v14  ;;  %v2199_v5 = vand.u32 4294901760, %v2198_v9  ;;  %v5922_v22 = vand.u32 4294901760, %v4910_v42  ;;  %v2216_v9 = vsub.f32 %v4924_v61, %v2215_v33 }
 0x11e   : > { %2049 = vmatpush.msrb.mxu0 %v5921_v55  ;;  %2141 = vmatpush.msrb.mxu2 %v4842_v58  ;;  %v4980_v55 = vand.u32 4294901760, %v342_v10 }
 0x11f   : > { %2100 = vmatpush.msrb.mxu1 %v4621_v37  ;;  %2188 = vmatpush.msrb.mxu3 %v2187_v13  ;;  %v2210_v14 = vsub.f32 %v4910_v42, %v5922_v22  ;;  %v2205_v37 = vand.u32 4294901760, %v2204_v12  ;;  %v5803_v13 = vand.u32 4294901760, %v4951_v59  ;;  %v5924_v22 = vand.u32 4294901760, %v4718_v46 }
 0x120   : > { %2053 = vmatpush.msrb.mxu0 %v5923_v6  ;;  %2143 = vmatpush.msrb.mxu2 %v4847_v25  ;;  %v2222_v12 = vsub.f32 %v4938_v24, %v2221_v32  ;;  %v338_v6 = vld [vmem:[%s3538_s18 + $0x118] sm:$0xff]  ;;  %v5925_v46 = vand.u32 4294901760, %v4732_v49  ;;  %v5926_v49 = vand.u32 4294901760, %v4737_v11 }
 0x121   : > { %2102 = vmatpush.msrb.mxu1 %v4629_v3  ;;  %2194 = vmatpush.msrb.mxu3 %v2193_v51  ;;  %v2211_v3 = vand.u32 4294901760, %v2210_v14  ;;  %v4992_v51 = vsub.f32 %v344_v50, %v4967_v35  ;;  %v2228_v14 = vsub.f32 %v4951_v59, %v5803_v13  ;;  %v5006_v50 = vsub.f32 %v342_v10, %v4980_v55 }
 0x122   : > { %2057 = vmatpush.msrb.mxu0 %v5924_v22  ;;  %2145 = vmatpush.msrb.mxu2 %v4860_v36  ;;  %v2239_v22 = vand.u32 4294901760, %v4978_v26  ;;  %v5927_v10 = vand.u32 4294901760, %v4750_v47  ;;  %v5928_v47 = vand.u32 4294901760, %v4771_v48 }
 0x123   : > { %2104 = vmatpush.msrb.mxu1 %v4637_v4  ;;  %2200 = vmatpush.msrb.mxu3 %v2199_v5  ;;  %v4998_v4 = vand.u32 4294901760, %v340_v34  ;;  %v2217_v5 = vand.u32 4294901760, %v2216_v9  ;;  %v2234_v9 = vsub.f32 %v4965_v63, %v2233_v41  ;;  %v2245_v13 = vand.u32 4294901760, %v4992_v51 }
 0x124   : > { %2061 = vmatpush.msrb.mxu0 %v5925_v46  ;;  %2147 = vmatpush.msrb.mxu2 %v4882_v57  ;;  %v336_v46 = vld [vmem:[%s3538_s18 + $0x108] sm:$0xff]  ;;  %v2229_v11 = vand.u32 4294901760, %v2228_v14  ;;  %v5929_v14 = vand.u32 4294901760, %v4784_v7 }
 0x125   : > { %2106 = vmatpush.msrb.mxu1 %v4648_v53  ;;  %2206 = vmatpush.msrb.mxu3 %v2205_v37  ;;  %v5011_v53 = vand.u32 4294901760, %v338_v6  ;;  %v2223_v37 = vand.u32 4294901760, %v2222_v12  ;;  %v2251_v12 = vand.u32 4294901760, %v5006_v50 }
 0x126   : > { %2065 = vmatpush.msrb.mxu0 %v5926_v49  ;;  %2149 = vmatpush.msrb.mxu2 %v4898_v17  ;;  %v5030_v49 = vand.u32 4294901760, %v336_v46 }
 0x127   : > { %2108 = vmatpush.msrb.mxu1 %v4659_v54  ;;  %2212 = vmatpush.msrb.mxu3 %v2211_v3  ;;  %v5023_v54 = vsub.f32 %v340_v34, %v4998_v4  ;;  %v2240_v3 = vsub.f32 %v4978_v26, %v2239_v22  ;;  %v2235_v34 = vand.u32 4294901760, %v2234_v9  ;;  %v5930_v9 = vand.u32 4294901760, %v4798_v40 }
 0x128   : > { %2069 = vmatpush.msrb.mxu0 %v5927_v10  ;;  %2151 = vmatpush.msrb.mxu2 %v4912_v30  ;;  %v5931_v10 = vand.u32 4294901760, %v4813_v8 }
 0x129   : > { %2110 = vmatpush.msrb.mxu1 %v4671_v56  ;;  %2218 = vmatpush.msrb.mxu3 %v2217_v5  ;;  %v5036_v56 = vsub.f32 %v338_v6, %v5011_v53  ;;  %v2246_v5 = vsub.f32 %v4992_v51, %v2245_v13  ;;  %v2257_v48 = vand.u32 4294901760, %v5023_v54  ;;  %v2252_v6 = vsub.f32 %v5006_v50, %v2251_v12 }
 0x12a   : > { %2073 = vmatpush.msrb.mxu0 %v5928_v47  ;;  %2153 = vmatpush.msrb.mxu2 %v4926_v21 }
 0x12b   : > { %2112 = vmatpush.msrb.mxu1 %v4686_v19  ;;  %2224 = vmatpush.msrb.mxu3 %v2223_v37  ;;  %v2241_v19 = vand.u32 4294901760, %v2240_v3  ;;  %v5051_v37 = vsub.f32 %v336_v46, %v5030_v49  ;;  %v2247_v7 = vand.u32 4294901760, %v2246_v5  ;;  %v2258_v46 = vsub.f32 %v5023_v54, %v2257_v48  ;;  %v469_v5 = vpop.f32.mrf.mxu0 }
 0x12c   : > { %2077 = vmatpush.msrb.mxu0 %v5929_v14  ;;  %2155 = vmatpush.msrb.mxu2 %v4940_v1  ;;  %v2253_v40 = vand.u32 4294901760, %v2252_v6  ;;  %v5936_v14 = vld [vmem:[#allocation9_spill] sm:$0xff]  ;;  %v624_v6 = vpop.f32.mrf.mxu2 }
 0x12d   : > { %2114 = vmatpush.msrb.mxu1 %v4700_v39  ;;  %2230 = vmatpush.msrb.mxu3 %v2229_v11  ;;  %v2263_v39 = vand.u32 4294901760, %v5036_v56  ;;  %v5932_v11 = vand.u32 4294901760, %v4824_v2  ;;  %v2259_v3 = vand.u32 4294901760, %v2258_v46  ;;  %v5934_v2 = vld [vmem:[#allocation11_spill] sm:$0xff]  ;;  %v5943_v46 = vld [vmem:[#allocation10_spill] sm:$0xff] }
 0x12e   : > { %2081 = vmatpush.msrb.mxu0 %v5930_v9  ;;  %2157 = vmatpush.msrb.mxu2 %v4953_v60  ;;  %v5938_v9 = vld [vmem:[#allocation7_spill] sm:$0xff] }
 0x12f   : > { %2116 = vmatpush.msrb.mxu1 %v4709_v18  ;;  %2236 = vmatpush.msrb.mxu3 %v2235_v34  ;;  %v2269_v18 = vand.u32 4294901760, %v5051_v37  ;;  %v2264_v8 = vsub.f32 %v5036_v56, %v2263_v39 }
 0x130   : > { %2085 = vmatpush.msrb.mxu0 %v5931_v10  ;;  %2159 = vmatpush.msrb.mxu2 %v4967_v35  ;;  %v5941_v10 = vld [vmem:[#allocation14_spill] sm:$0xff] }
 0x131   : > { %2118 = vmatpush.msrb.mxu1 %v4722_v31  ;;  %2242 = vmatpush.msrb.mxu3 %v2241_v19  ;;  %v5933_v31 = vand.u32 4294901760, %v4840_v43  ;;  %v2265_v47 = vand.u32 4294901760, %v2264_v8  ;;  %v5935_v43 = vld [vmem:[#allocation8_spill] sm:$0xff]  ;;  %v5937_v19 = vand.u32 4294901760, %v4832_v29 }
 0x132   : > { %2089 = vmatpush.msrb.mxu0 %v5932_v11  ;;  %2161 = vmatpush.msrb.mxu2 %v4980_v55 }
 0x133   : > { %2120 = vmatpush.msrb.mxu1 %v4744_v15  ;;  %2248 = vmatpush.msrb.mxu3 %v2247_v7  ;;  %v2270_v15 = vsub.f32 %v5051_v37, %v2269_v18 }
 0x134   : > { %2093 = vmatpush.msrb.mxu0 %v5933_v31  ;;  %2163 = vmatpush.msrb.mxu2 %v4998_v4  ;;  %v5947_v31 = vld [vmem:[#allocation12_spill] sm:$0xff] }
 0x135   : > { %2122 = vmatpush.msrb.mxu1 %v4757_v45  ;;  %2254 = vmatpush.msrb.mxu3 %v2253_v40  ;;  %v570_v45 = vpop.f32.mrf.mxu1  ;;  %v2271_v34 = vand.u32 4294901760, %v2270_v15  ;;  %v5945_v40 = vand.u32 4294901760, %v4910_v42 }
 0x136   : > { %1832 = vmatmul.f32.vlgmr.msra.gmra.mxu0 %v5934_v2  ;;  %2165 = vmatpush.msrb.mxu2 %v5011_v53  ;;  %v384_v2 = vld [vmem:[%s3538_s18 + $0x288] sm:$0xff] }
 0x137   : > { %2124 = vmatpush.msrb.mxu1 %v4768_v62  ;;  %2280 = vmatpush.msra.mxu0 %v4832_v29  ;;  %v571_v62 = vadd.f32 %v570_v45, %v469_v5  ;;  %v663_v29 = vpop.f32.mrf.mxu3  ;;  %v382_v45 = vld [vmem:[%s3538_s18 + $0x278] sm:$0xff] }
 0x138   : > { %2260 = vmatpush.msrb.mxu3 %v2259_v3  ;;  %1987 = vmatmul.f32.vlgmr.msra.gmra.mxu2 %v5935_v43 }
 0x139   : > { %2283 = vmatpush.msra.mxu0 %v4855_v27  ;;  %2126 = vmatpush.msrb.mxu1 %v4781_v16  ;;  %v5939_v16 = vand.u32 4294901760, %v4855_v27  ;;  %v625_v7 = vadd.f32 %v624_v6, %v571_v62  ;;  %v5942_v27 = vand.u32 4294901760, %v4874_v23 }
 0x13a   : > { %2167 = vmatpush.msrb.mxu2 %v5030_v49  ;;  %2266 = vmatpush.msrb.mxu3 %v2265_v47 }
 0x13b   : > { %2026 = vmatmul.f32.vlgmr.msra.gmra.mxu3 %v5936_v14  ;;  %2286 = vmatpush.msra.mxu0 %v4869_v28 }
 0x13c   : > { %2374 = vmatpush.msra.mxu2 %v5937_v19  ;;  %2128 = vmatpush.msrb.mxu1 %v4794_v0  ;;  %v5940_v0 = vand.u32 4294901760, %v4869_v28  ;;  %v5944_v28 = vand.u32 4294901760, %v4890_v20  ;;  %v380_v19 = vld [vmem:[%s3538_s18 + $0x268] sm:$0xff] }
 0x13d   : > { %2272 = vmatpush.msrb.mxu3 %v2271_v34  ;;  %1933 = vmatmul.f32.vlgmr.msra.gmra.mxu1 %v5938_v9 }
 0x13e   : > { %2289 = vmatpush.msra.mxu0 %v4874_v23  ;;  %2378 = vmatpush.msra.mxu2 %v5939_v16 }
 0x13f   : > { %2441 = vmatpush.msra.mxu3 %v4805_v38  ;;  %2130 = vmatpush.msrb.mxu1 %v4809_v52  ;;  %v664_v52 = vadd.f32 %v663_v29, %v625_v7  ;;  %v5239_v7 = vand.u32 4294901760, %v382_v45 }
 0x140   : > { %2292 = vmatpush.msra.mxu0 %v4890_v20  ;;  %2382 = vmatpush.msra.mxu2 %v5940_v0  ;;  %v911_v20 = vpop.f32.mrf.mxu3 }
 0x141   : > { %2333 = vmatpush.msra.mxu1 %v4805_v38  ;;  %2443 = vmatpush.msra.mxu3 %v4826_v44  ;;  %v732_v38 = vpop.f32.mrf.mxu0 }
 0x142   : > { %2173 = vmatmul.f32.vlgmr.msrb.gmra.mxu2 %v5941_v10  ;;  %2295 = vmatpush.msra.mxu0 %v4910_v42  ;;  %v733_v23 = vadd.f32 %v732_v38, %v664_v52  ;;  %v5946_v42 = vand.u32 4294901760, %v4951_v59  ;;  %v378_v10 = vld [vmem:[%s3538_s18 + $0x258] sm:$0xff]  ;;  %v5253_v38 = vand.u32 4294901760, %v380_v19 }
 0x143   : > { %2335 = vmatpush.msra.mxu1 %v4826_v44  ;;  %2386 = vmatpush.msra.mxu2 %v5942_v27  ;;  %v769_v44 = vpop.f32.mrf.mxu1 }
 0x144   : > { %2445 = vmatpush.msra.mxu3 %v4842_v58  ;;  %2095 = vmatmul.f32.vlgmr.msrb.gmra.mxu0 %v5938_v9 }
 0x145   : > { %2274 = vmatmul.f32.vlgmr.msrb.gmra.mxu3 %v5943_v46  ;;  %2298 = vmatpush.msra.mxu0 %v4924_v61  ;;  %v398_v61 = vld [vmem:[%s3538_s18 + $0x2f8] sm:$0xff] }
 0x146   : > { %2337 = vmatpush.msra.mxu1 %v4842_v58  ;;  %2390 = vmatpush.msra.mxu2 %v5944_v28  ;;  %v770_v58 = vadd.f32 %v769_v44, %v733_v23  ;;  %v5948_v23 = vld [vmem:[#allocation13_spill] sm:$0xff]  ;;  %v376_v44 = vld [vmem:[%s3538_s18 + $0x248] sm:$0xff] }
 0x147   : > { %2447 = vmatpush.msra.mxu3 %v4847_v25  ;;  %2132 = vmatmul.f32.vlgmr.msrb.gmra.mxu1 %v5938_v9 }
 0x148   : > { %2301 = vmatpush.msra.mxu0 %v4938_v24  ;;  %2339 = vmatpush.msra.mxu1 %v4847_v25  ;;  %v810_v25 = vpop.f32.mrf.mxu2  ;;  %v1110_v47 = vpop.f32.mrf.mxu3 }
 0x149   : > { %2394 = vmatpush.msra.mxu2 %v5945_v40  ;;  %2449 = vmatpush.msra.mxu3 %v4860_v36  ;;  %v965_v24 = vpop.f32.mrf.mxu0 }
 0x14a   : > { %2304 = vmatpush.msra.mxu0 %v4951_v59  ;;  %2341 = vmatpush.msra.mxu1 %v4860_v36  ;;  %v811_v36 = vadd.f32 %v810_v25, %v770_v58  ;;  %v5265_v25 = vand.u32 4294901760, %v378_v10 }
 0x14b   : > { %2398 = vmatpush.msra.mxu2 %v2215_v33  ;;  %2451 = vmatpush.msra.mxu3 %v4882_v57  ;;  %v394_v33 = vld [vmem:[%s3538_s18 + $0x2d8] sm:$0xff] }
 0x14c   : > { %2307 = vmatpush.msra.mxu0 %v4965_v63  ;;  %2343 = vmatpush.msra.mxu1 %v4882_v57  ;;  %v396_v57 = vld [vmem:[%s3538_s18 + $0x2e8] sm:$0xff]  ;;  %v912_v59 = vadd.f32 %v911_v20, %v811_v36  ;;  %v1004_v63 = vpop.f32.mrf.mxu1 }
 0x14d   : > { %2402 = vmatpush.msra.mxu2 %v2221_v32  ;;  %2453 = vmatpush.msra.mxu3 %v4898_v17  ;;  %v392_v32 = vld [vmem:[%s3538_s18 + $0x2c8] sm:$0xff] }
 0x14e   : > { %2310 = vmatpush.msra.mxu0 %v4978_v26  ;;  %2345 = vmatpush.msra.mxu1 %v4898_v17  ;;  %v5145_v17 = vand.u32 4294901760, %v398_v61 }
 0x14f   : > { %2406 = vmatpush.msra.mxu2 %v5946_v42  ;;  %2455 = vmatpush.msra.mxu3 %v4912_v30  ;;  %v5269_v42 = vsub.f32 %v382_v45, %v5239_v7 }
 0x150   : > { %2313 = vmatpush.msra.mxu0 %v4992_v51  ;;  %2347 = vmatpush.msra.mxu1 %v4912_v30  ;;  %v5153_v30 = vand.u32 4294901760, %v396_v57  ;;  %v5164_v26 = vsub.f32 %v398_v61, %v5145_v17  ;;  %v388_v51 = vld [vmem:[%s3538_s18 + $0x2a8] sm:$0xff] }
 0x151   : > { %2410 = vmatpush.msra.mxu2 %v2233_v41  ;;  %2457 = vmatpush.msra.mxu3 %v4926_v21  ;;  %v390_v41 = vld [vmem:[%s3538_s18 + $0x2b8] sm:$0xff]  ;;  %v5191_v3 = vand.u32 4294901760, %v388_v51  ;;  %v1151_v34 = vpop.f32.mrf.mxu0 }
 0x152   : > { %2316 = vmatpush.msra.mxu0 %v5006_v50  ;;  %2349 = vmatpush.msra.mxu1 %v4926_v21  ;;  %v5161_v21 = vand.u32 4294901760, %v394_v33  ;;  %v5180_v8 = vand.u32 4294901760, %v390_v41  ;;  %v2520_v50 = vand.u32 4294901760, %v5164_v26 }
 0x153   : > { %2414 = vmatpush.msra.mxu2 %v2239_v22  ;;  %2459 = vmatpush.msra.mxu3 %v4940_v1  ;;  %v966_v22 = vadd.f32 %v965_v24, %v912_v59  ;;  %v5282_v59 = vsub.f32 %v380_v19, %v5253_v38 }
 0x154   : > { %2319 = vmatpush.msra.mxu0 %v5023_v54  ;;  %2351 = vmatpush.msra.mxu1 %v4940_v1  ;;  %v5172_v1 = vand.u32 4294901760, %v392_v32  ;;  %v1252_v6 = vpop.f32.mrf.mxu1 }
 0x155   : > { %2418 = vmatpush.msra.mxu2 %v2245_v13  ;;  %2461 = vmatpush.msra.mxu3 %v4953_v60  ;;  %v5175_v13 = vsub.f32 %v396_v57, %v5153_v30  ;;  %v1005_v11 = vadd.f32 %v1004_v63, %v966_v22  ;;  %v374_v57 = vld [vmem:[%s3538_s18 + $0x238] sm:$0xff]  ;;  %v1345_v22 = vpop.f32.mrf.mxu3 }
 0x156   : > { %2322 = vmatpush.msra.mxu0 %v5036_v56  ;;  %2353 = vmatpush.msra.mxu1 %v4953_v60  ;;  %v1073_v60 = vpop.f32.mrf.mxu2  ;;  %v2521_v56 = vsub.f32 %v5164_v26, %v2520_v50 }
 0x157   : > { %2422 = vmatpush.msra.mxu2 %v2251_v12  ;;  %2463 = vmatpush.msra.mxu3 %v4967_v35  ;;  %v5187_v12 = vsub.f32 %v394_v33, %v5161_v21  ;;  %v2526_v54 = vand.u32 4294901760, %v5175_v13  ;;  %v1074_v15 = vadd.f32 %v1073_v60, %v1005_v11  ;;  %v5278_v33 = vand.u32 4294901760, %v376_v44 }
 0x158   : > { %2325 = vmatpush.msra.mxu0 %v5051_v37  ;;  %2355 = vmatpush.msra.mxu1 %v4967_v35  ;;  %v386_v35 = vld [vmem:[%s3538_s18 + $0x298] sm:$0xff]  ;;  %v2522_v9 = vand.u32 4294901760, %v2521_v56  ;;  %v5291_v11 = vand.u32 4294901760, %v374_v57  ;;  %v5808_v60 = vand.u32 4294901760, %v5269_v42  ;;  %v5807_v56 = vand.u32 4294901760, %v5282_v59 }
 0x159   : > { %2426 = vmatpush.msra.mxu2 %v2257_v48  ;;  %2465 = vmatpush.msra.mxu3 %v4980_v55  ;;  %v5199_v48 = vsub.f32 %v392_v32, %v5172_v1  ;;  %v2532_v43 = vand.u32 4294901760, %v5187_v12  ;;  %v2527_v37 = vsub.f32 %v5175_v13, %v2526_v54  ;;  %v1111_v14 = vadd.f32 %v1110_v47, %v1074_v15  ;;  %v1414_v15 = vpop.f32.mrf.mxu0 }
 0x15a   : > { %2328 = vmatmul.f32.vlgmr.msra.gmra.mxu0 %v5947_v31  ;;  %2357 = vmatpush.msra.mxu1 %v4980_v55  ;;  %v5204_v55 = vsub.f32 %v390_v41, %v5180_v8  ;;  %v372_v41 = vld [vmem:[%s3538_s18 + $0x228] sm:$0xff]  ;;  %v5295_v31 = vsub.f32 %v378_v10, %v5265_v25  ;;  %v5307_v45 = vsub.f32 %v376_v44, %v5278_v33 }
 0x15b   : > { %2478 = vmatpush.msrb.mxu0 %v5145_v17  ;;  %2430 = vmatpush.msra.mxu2 %v2263_v39  ;;  %v5213_v39 = vand.u32 4294901760, %v386_v35  ;;  %v5815_v5 = vand.u32 4294901760, %v5199_v48  ;;  %v2533_v16 = vsub.f32 %v5187_v12, %v2532_v43  ;;  %v2528_v27 = vand.u32 4294901760, %v2527_v37 }
 0x15c   : > { %2467 = vmatpush.msra.mxu3 %v4998_v4  ;;  %2359 = vmatpush.msra.mxu1 %v4998_v4  ;;  %v5219_v4 = vsub.f32 %v388_v51, %v5191_v3  ;;  %v5813_v62 = vand.u32 4294901760, %v5204_v55  ;;  %v5303_v47 = vand.u32 4294901760, %v372_v41 }
 0x15d   : > { %2480 = vmatpush.msrb.mxu0 %v5153_v30  ;;  %2434 = vmatpush.msra.mxu2 %v2269_v18  ;;  %v5227_v18 = vand.u32 4294901760, %v384_v2  ;;  %v5242_v29 = vsub.f32 %v386_v35, %v5213_v39  ;;  %v2539_v52 = vsub.f32 %v5199_v48, %v5815_v5  ;;  %v2534_v58 = vand.u32 4294901760, %v2533_v16 }
 0x15e   : > { %2469 = vmatpush.msra.mxu3 %v5011_v53  ;;  %2436 = vmatmul.f32.vlgmr.msra.gmra.mxu2 %v5943_v46  ;;  %v5812_v0 = vand.u32 4294901760, %v5219_v4  ;;  %v1306_v40 = vpop.f32.mrf.mxu2  ;;  %v5318_v16 = vsub.f32 %v374_v57, %v5291_v11  ;;  %v5332_v44 = vsub.f32 %v372_v41, %v5303_v47 }
 0x15f   : > { %2482 = vmatpush.msrb.mxu0 %v5161_v21  ;;  %2621 = vmatpush.msrb.mxu2 %v5164_v26  ;;  %v5811_v61 = vand.u32 4294901760, %v5242_v29  ;;  %v2540_v20 = vand.u32 4294901760, %v2539_v52  ;;  %v368_v52 = vld [vmem:[%s3538_s18 + $0x208] sm:$0xff] }
 0x160   : > { %2361 = vmatpush.msra.mxu1 %v5011_v53  ;;  %2471 = vmatpush.msra.mxu3 %v5030_v49  ;;  %v1152_v53 = vadd.f32 %v1151_v34, %v1111_v14  ;;  %v2551_v36 = vsub.f32 %v5219_v4, %v5812_v0  ;;  %v370_v34 = vld [vmem:[%s3538_s18 + $0x218] sm:$0xff]  ;;  %v1451_v14 = vpop.f32.mrf.mxu1  ;;  %v5804_v41 = vand.u32 4294901760, %v5318_v16 }
 0x161   : > { %2473 = vmatmul.f32.vlgmr.msra.gmra.mxu3 %v5943_v46  ;;  %2484 = vmatpush.msrb.mxu0 %v5172_v1  ;;  %v5256_v46 = vsub.f32 %v384_v2, %v5227_v18  ;;  %v2557_v51 = vsub.f32 %v5242_v29, %v5811_v61 }
 0x162   : > { %2624 = vmatpush.msrb.mxu2 %v5175_v13  ;;  %2674 = vmatpush.msrb.mxu3 %v5145_v17  ;;  %v1253_v28 = vadd.f32 %v1252_v6, %v1152_v53  ;;  %v2552_v35 = vand.u32 4294901760, %v2551_v36  ;;  %v2569_v6 = vsub.f32 %v5269_v42, %v5808_v60  ;;  %v430_v53 = vld [vmem:[%s3538_s18 + $0x3f8] sm:$0xff]  ;;  %v428_v36 = vld [vmem:[%s3538_s18 + $0x3e8] sm:$0xff] }
 0x163   : > { %2363 = vmatpush.msra.mxu1 %v5030_v49  ;;  %2486 = vmatpush.msrb.mxu0 %v5180_v8  ;;  %v2545_v49 = vsub.f32 %v5204_v55, %v5813_v62  ;;  %v5810_v24 = vand.u32 4294901760, %v5256_v46  ;;  %v2558_v19 = vand.u32 4294901760, %v2557_v51  ;;  %v426_v51 = vld [vmem:[%s3538_s18 + $0x3d8] sm:$0xff]  ;;  %v420_v60 = vld [vmem:[%s3538_s18 + $0x3a8] sm:$0xff] }
 0x164   : > { %2367 = vmatmul.f32.vlgmr.msra.gmra.mxu1 %v5948_v23  ;;  %2627 = vmatpush.msrb.mxu2 %v5187_v12  ;;  %v1307_v32 = vadd.f32 %v1306_v40, %v1253_v28  ;;  %v2575_v23 = vsub.f32 %v5282_v59, %v5807_v56  ;;  %v5409_v62 = vand.u32 4294901760, %v420_v60 }
 0x165   : > { %2523 = vmatpush.msrb.mxu1 %v2522_v9  ;;  %2676 = vmatpush.msrb.mxu3 %v5153_v30  ;;  %v2546_v63 = vand.u32 4294901760, %v2545_v49  ;;  %v2563_v2 = vsub.f32 %v5256_v46, %v5810_v24  ;;  %v5806_v9 = vand.u32 4294901760, %v5295_v31  ;;  %v5805_v49 = vand.u32 4294901760, %v5307_v45  ;;  %v418_v24 = vld [vmem:[%s3538_s18 + $0x398] sm:$0xff] }
 0x166   : > { %2488 = vmatpush.msrb.mxu0 %v5191_v3  ;;  %2630 = vmatpush.msrb.mxu2 %v5199_v48  ;;  %v1346_v37 = vadd.f32 %v1345_v22, %v1307_v32  ;;  %v1492_v57 = vpop.f32.mrf.mxu2  ;;  %v5426_v5 = vand.u32 4294901760, %v418_v24 }
 0x167   : > { %2529 = vmatpush.msrb.mxu1 %v2528_v27  ;;  %2678 = vmatpush.msrb.mxu3 %v5161_v21  ;;  %v5323_v27 = vand.u32 4294901760, %v370_v34  ;;  %v2564_v28 = vand.u32 4294901760, %v2563_v2  ;;  %v2581_v32 = vsub.f32 %v5295_v31, %v5806_v9  ;;  %v5809_v2 = vand.u32 4294901760, %v5332_v44 }
 0x168   : > { %2490 = vmatpush.msrb.mxu0 %v5213_v39  ;;  %2633 = vmatpush.msrb.mxu2 %v5204_v55  ;;  %v1415_v10 = vadd.f32 %v1414_v15, %v1346_v37  ;;  %v2587_v15 = vsub.f32 %v5307_v45, %v5805_v49  ;;  %v5357_v37 = vand.u32 4294901760, %v428_v36 }
 0x169   : > { %2535 = vmatpush.msrb.mxu1 %v2534_v58  ;;  %2680 = vmatpush.msrb.mxu3 %v5172_v1  ;;  %5949 = vst [vmem:[#allocation11_spill] sm:$0xff] %v5323_v27  ;;  %v5336_v58 = vand.u32 4294901760, %v430_v53  ;;  %v5349_v22 = vsub.f32 %v370_v34, %v5323_v27 }
 0x16a   : > { %2492 = vmatpush.msrb.mxu0 %v5227_v18  ;;  %2636 = vmatpush.msrb.mxu2 %v5219_v4  ;;  %v1452_v40 = vadd.f32 %v1451_v14, %v1415_v10  ;;  %v424_v14 = vld [vmem:[%s3538_s18 + $0x3c8] sm:$0xff]  ;;  %v2582_v10 = vand.u32 4294901760, %v2581_v32  ;;  %v2588_v32 = vand.u32 4294901760, %v2587_v15  ;;  %v5385_v49 = vsub.f32 %v428_v36, %v5357_v37 }
 0x16b   : > { %2541 = vmatpush.msrb.mxu1 %v2540_v20  ;;  %2682 = vmatpush.msrb.mxu3 %v5180_v8  ;;  %v2570_v20 = vand.u32 4294901760, %v2569_v6  ;;  %v5363_v34 = vsub.f32 %v430_v53, %v5336_v58  ;;  %v1593_v6 = vpop.f32.mrf.mxu3  ;;  %v5814_v53 = vand.u32 4294901760, %v5349_v22 }
 0x16c   : > { %2494 = vmatpush.msrb.mxu0 %v5239_v7  ;;  %2639 = vmatpush.msrb.mxu2 %v5242_v29 }
 0x16d   : > { %2547 = vmatpush.msrb.mxu1 %v2546_v63  ;;  %2684 = vmatpush.msrb.mxu3 %v5191_v3  ;;  %v5343_v63 = vand.u32 4294901760, %v368_v52  ;;  %v5816_v56 = vand.u32 4294901760, %v5363_v34 }
 0x16e   : > { %2496 = vmatpush.msrb.mxu0 %v5253_v38  ;;  %2642 = vmatpush.msrb.mxu2 %v5256_v46 }
 0x16f   : > { %2553 = vmatpush.msrb.mxu1 %v2552_v35  ;;  %2686 = vmatpush.msrb.mxu3 %v5213_v39  ;;  %v2576_v35 = vand.u32 4294901760, %v2575_v23  ;;  %v5370_v23 = vsub.f32 %v368_v52, %v5343_v63  ;;  %v2599_v52 = vsub.f32 %v5332_v44, %v5809_v2 }
 0x170   : > { %2498 = vmatpush.msrb.mxu0 %v5265_v25  ;;  %2645 = vmatpush.msrb.mxu2 %v5269_v42 }
 0x171   : > { %2559 = vmatpush.msrb.mxu1 %v2558_v19  ;;  %2688 = vmatpush.msrb.mxu3 %v5227_v18  ;;  %v1493_v19 = vadd.f32 %v1492_v57, %v1452_v40  ;;  %v5372_v40 = vand.u32 4294901760, %v426_v51  ;;  %v422_v57 = vld [vmem:[%s3538_s18 + $0x3b8] sm:$0xff]  ;;  %v5817_v2 = vand.u32 4294901760, %v5370_v23 }
 0x172   : > { %2500 = vmatpush.msrb.mxu0 %v5278_v33  ;;  %2648 = vmatpush.msrb.mxu2 %v5282_v59 }
 0x173   : > { %2565 = vmatpush.msrb.mxu1 %v2564_v28  ;;  %2690 = vmatpush.msrb.mxu3 %v5239_v7  ;;  %v2593_v28 = vsub.f32 %v5318_v16, %v5804_v41  ;;  %v1647_v41 = vpop.f32.mrf.mxu0  ;;  %v1594_v9 = vadd.f32 %v1593_v6, %v1493_v19  ;;  %v5396_v36 = vsub.f32 %v426_v51, %v5372_v40  ;;  %v5818_v51 = vand.u32 4294901760, %v5385_v49 }
 0x174   : > { %2502 = vmatpush.msrb.mxu0 %v5291_v11  ;;  %2651 = vmatpush.msrb.mxu2 %v5295_v31  ;;  %v2605_v6 = vsub.f32 %v5349_v22, %v5814_v53 }
 0x175   : > { %2571 = vmatpush.msrb.mxu1 %v2570_v20  ;;  %2692 = vmatpush.msrb.mxu3 %v5253_v38  ;;  %v5378_v20 = vand.u32 4294901760, %v424_v14  ;;  %v2594_v15 = vand.u32 4294901760, %v2593_v28  ;;  %v1648_v19 = vadd.f32 %v1647_v41, %v1594_v9  ;;  %v2600_v28 = vand.u32 4294901760, %v2599_v52  ;;  %v5950_v9 = vld [vmem:[#allocation17_spill] sm:$0xff]  ;;  %v416_v52 = vld [vmem:[%s3538_s18 + $0x388] sm:$0xff] }
 0x176   : > { %2504 = vmatpush.msrb.mxu0 %v5303_v47  ;;  %2654 = vmatpush.msrb.mxu2 %v5307_v45  ;;  %v2862_v41 = vsub.f32 %v5363_v34, %v5816_v56  ;;  %v301_v56 = vld [vmem:[#allocation2] sm:$0xff]  ;;  %v5440_v53 = vand.u32 4294901760, %v416_v52 }
 0x177   : > { %2577 = vmatpush.msrb.mxu1 %v2576_v35  ;;  %2694 = vmatpush.msrb.mxu3 %v5265_v25  ;;  %v5390_v35 = vand.u32 4294901760, %v422_v57 }
 0x178   : > { %2506 = vmatpush.msrb.mxu0 %v5323_v27  ;;  %2657 = vmatpush.msrb.mxu2 %v5318_v16 }
 0x179   : > { %2583 = vmatpush.msrb.mxu1 %v2582_v10  ;;  %2696 = vmatpush.msrb.mxu3 %v5278_v33  ;;  %v5404_v10 = vsub.f32 %v424_v14, %v5378_v20 }
 0x17a   : > { %2508 = vmatpush.msrb.mxu0 %v5343_v63  ;;  %2660 = vmatpush.msrb.mxu2 %v5332_v44 }
 0x17b   : > { %2589 = vmatpush.msrb.mxu1 %v2588_v32  ;;  %2698 = vmatpush.msrb.mxu3 %v5291_v11  ;;  %v1686_v61 = vpop.f32.mrf.mxu1  ;;  %v1755_v0 = vpop.f32.mrf.mxu2  ;;  %v5417_v32 = vsub.f32 %v422_v57, %v5390_v35 }
 0x17c   : > { %2514 = vmatmul.f32.vlgmr.msrb.gmra.mxu0 %v5950_v9  ;;  %2663 = vmatpush.msrb.mxu2 %v5349_v22  ;;  %v1687_v14 = vadd.f32 %v1686_v61, %v1648_v19  ;;  %v2611_v9 = vsub.f32 %v5370_v23, %v5817_v2  ;;  %v2606_v61 = vand.u32 4294901760, %v2605_v6  ;;  %v5438_v2 = vsub.f32 %v420_v60, %v5409_v62 }
 0x17d   : > { %2715 = vmatpush.msra.mxu0 %v2520_v50  ;;  %2595 = vmatpush.msrb.mxu1 %v2594_v15  ;;  %v414_v50 = vld [vmem:[%s3538_s18 + $0x378] sm:$0xff]  ;;  %v2868_v15 = vsub.f32 %v5385_v49, %v5818_v51  ;;  %v2863_v6 = vand.u32 4294901760, %v2862_v41  ;;  %v2885_v13 = vand.u32 4294901760, %v5417_v32  ;;  %v5952_v60 = vand.u32 4294901760, %v5396_v36 }
 0x17e   : > { %2700 = vmatpush.msrb.mxu3 %v5303_v47  ;;  %2666 = vmatpush.msrb.mxu2 %v5370_v23  ;;  %v1756_v57 = vadd.f32 %v1755_v0, %v1687_v14  ;;  %v1792_v26 = vpop.f32.mrf.mxu3  ;;  %v5951_v0 = vld [vmem:[#allocation15_spill] sm:$0xff]  ;;  %v5453_v19 = vsub.f32 %v418_v24, %v5426_v5  ;;  %v5953_v41 = vand.u32 4294901760, %v5404_v10  ;;  %v5820_v24 = vand.u32 4294901760, %v5438_v2 }
 0x17f   : > { %2719 = vmatpush.msra.mxu0 %v2526_v54  ;;  %2601 = vmatpush.msrb.mxu1 %v2600_v28  ;;  %v412_v54 = vld [vmem:[%s3538_s18 + $0x368] sm:$0xff]  ;;  %v2612_v28 = vand.u32 4294901760, %v2611_v9  ;;  %v2874_v51 = vsub.f32 %v5396_v36, %v5952_v60  ;;  %v5954_v9 = vld [vmem:[#allocation16_spill] sm:$0xff]  ;;  %v5467_v60 = vsub.f32 %v416_v52, %v5440_v53 }
 0x180   : > { %2702 = vmatpush.msrb.mxu3 %v5323_v27  ;;  %2669 = vmatmul.f32.vlgmr.msrb.gmra.mxu2 %v5951_v0  ;;  %v1793_v14 = vadd.f32 %v1792_v26, %v1756_v57  ;;  %v5455_v27 = vand.u32 4294901760, %v414_v50  ;;  %v2880_v12 = vsub.f32 %v5404_v10, %v5953_v41  ;;  %v410_v57 = vld [vmem:[%s3538_s18 + $0x358] sm:$0xff]  ;;  %v5955_v26 = vand.u32 4294901760, %v5199_v48 }
 0x181   : > { %2723 = vmatpush.msra.mxu0 %v2532_v43  ;;  %2819 = vmatpush.msra.mxu2 %v5336_v58  ;;  %v2869_v0 = vand.u32 4294901760, %v2868_v15  ;;  %v5956_v48 = vand.u32 4294901760, %v5204_v55  ;;  %v2875_v15 = vand.u32 4294901760, %v2874_v51  ;;  %v5821_v52 = vand.u32 4294901760, %v5453_v19 }
 0x182   : > { %2607 = vmatpush.msrb.mxu1 %v2606_v61  ;;  %2704 = vmatpush.msrb.mxu3 %v5343_v63  ;;  %v3159_v43 = vadd.f32 %v1793_v14, %v301_v56  ;;  %v5469_v61 = vand.u32 4294901760, %v412_v54  ;;  %v2886_v56 = vsub.f32 %v5417_v32, %v2885_v13  ;;  %v408_v14 = vld [vmem:[%s3538_s18 + $0x348] sm:$0xff]  ;;  %v5480_v41 = vsub.f32 %v414_v50, %v5455_v27 }
 0x183   : > { %2708 = vmatmul.f32.vlgmr.msrb.gmra.mxu3 %v5954_v9  ;;  %2727 = vmatpush.msra.mxu0 %v5955_v26  ;;  %v5482_v9 = vand.u32 4294901760, %v410_v57  ;;  %v5957_v26 = vld [vmem:[#allocation6_spill] sm:$0xff]  ;;  %v2892_v55 = vsub.f32 %v5438_v2, %v5820_v24  ;;  %v5822_v51 = vand.u32 4294901760, %v5467_v60 }
 0x184   : > { %2821 = vmatpush.msra.mxu2 %v5357_v37  ;;  %2864 = vmatpush.msra.mxu3 %v2863_v6  ;;  %3161 = vst [vmem:[#allocation2] sm:$0xff] %v3159_v43  ;;  %v2881_v6 = vand.u32 4294901760, %v2880_v12  ;;  %v406_v43 = vld [vmem:[%s3538_s18 + $0x338] sm:$0xff]  ;;  %v5493_v50 = vsub.f32 %v412_v54, %v5469_v61  ;;  %v2887_v12 = vand.u32 4294901760, %v2886_v56 }
 0x185   : > { %2613 = vmatpush.msrb.mxu1 %v2612_v28  ;;  %2731 = vmatpush.msra.mxu0 %v5956_v48  ;;  %v5495_v28 = vand.u32 4294901760, %v408_v14  ;;  %v5958_v48 = vand.u32 4294901760, %v5219_v4  ;;  %v5506_v54 = vsub.f32 %v410_v57, %v5482_v9  ;;  %v5508_v24 = vand.u32 4294901760, %v406_v43  ;;  %v404_v4 = vld [vmem:[%s3538_s18 + $0x328] sm:$0xff] }
 0x186   : > { %2615 = vmatmul.f32.vlgmr.msrb.gmra.mxu1 %v5957_v26  ;;  %2823 = vmatpush.msra.mxu2 %v5372_v40  ;;  %v2904_v56 = vsub.f32 %v5467_v60, %v5822_v51  ;;  %v2915_v57 = vand.u32 4294901760, %v5493_v50  ;;  %v400_v51 = vld [vmem:[%s3538_s18 + $0x308] sm:$0xff] }
 0x187   : > { %2782 = vmatpush.msra.mxu1 %v5145_v17  ;;  %2870 = vmatpush.msra.mxu3 %v2869_v0  ;;  %v2898_v17 = vsub.f32 %v5453_v19, %v5821_v52  ;;  %v2909_v0 = vand.u32 4294901760, %v5480_v41  ;;  %v402_v52 = vld [vmem:[%s3538_s18 + $0x318] sm:$0xff] }
 0x188   : > { %2735 = vmatpush.msra.mxu0 %v5958_v48  ;;  %2825 = vmatpush.msra.mxu2 %v5378_v20  ;;  %v5959_v48 = vand.u32 4294901760, %v5242_v29  ;;  %v5960_v29 = vand.u32 4294901760, %v5256_v46  ;;  %v5961_v46 = vand.u32 4294901760, %v5269_v42 }
 0x189   : > { %2784 = vmatpush.msra.mxu1 %v5153_v30  ;;  %2876 = vmatpush.msra.mxu3 %v2875_v15  ;;  %v2893_v30 = vand.u32 4294901760, %v2892_v55  ;;  %v5520_v15 = vsub.f32 %v408_v14, %v5495_v28  ;;  %v2921_v55 = vand.u32 4294901760, %v5506_v54  ;;  %v5534_v14 = vsub.f32 %v406_v43, %v5508_v24 }
 0x18a   : > { %2739 = vmatpush.msra.mxu0 %v5959_v48  ;;  %2827 = vmatpush.msra.mxu2 %v5390_v35  ;;  %v5526_v48 = vand.u32 4294901760, %v404_v4  ;;  %v5962_v43 = vand.u32 4294901760, %v5282_v59  ;;  %v5963_v59 = vand.u32 4294901760, %v5295_v31 }
 0x18b   : > { %2786 = vmatpush.msra.mxu1 %v5161_v21  ;;  %2882 = vmatpush.msra.mxu3 %v2881_v6  ;;  %v2899_v21 = vand.u32 4294901760, %v2898_v17  ;;  %v2910_v6 = vsub.f32 %v5480_v41, %v2909_v0  ;;  %v2927_v17 = vand.u32 4294901760, %v5520_v15 }
 0x18c   : > { %2743 = vmatpush.msra.mxu0 %v5960_v29  ;;  %2829 = vmatpush.msra.mxu2 %v5409_v62  ;;  %v5540_v29 = vand.u32 4294901760, %v402_v52  ;;  %v5551_v42 = vsub.f32 %v404_v4, %v5526_v48 }
 0x18d   : > { %2788 = vmatpush.msra.mxu1 %v5172_v1  ;;  %2888 = vmatpush.msra.mxu3 %v2887_v12  ;;  %v2905_v1 = vand.u32 4294901760, %v2904_v56  ;;  %v2916_v12 = vsub.f32 %v5493_v50, %v2915_v57  ;;  %v2933_v56 = vand.u32 4294901760, %v5534_v14 }
 0x18e   : > { %2747 = vmatpush.msra.mxu0 %v5961_v46  ;;  %2831 = vmatpush.msra.mxu2 %v5426_v5  ;;  %v5553_v46 = vand.u32 4294901760, %v400_v51  ;;  %v5564_v4 = vsub.f32 %v402_v52, %v5540_v29  ;;  %v2939_v31 = vand.u32 4294901760, %v5551_v42 }
 0x18f   : > { %2790 = vmatpush.msra.mxu1 %v5180_v8  ;;  %2894 = vmatpush.msra.mxu3 %v2893_v30  ;;  %v2911_v8 = vand.u32 4294901760, %v2910_v6  ;;  %v2922_v30 = vsub.f32 %v5506_v54, %v2921_v55  ;;  %v5964_v6 = vand.u32 4294901760, %v5307_v45  ;;  %v2934_v52 = vsub.f32 %v5534_v14, %v2933_v56 }
 0x190   : > { %2751 = vmatpush.msra.mxu0 %v5962_v43  ;;  %2833 = vmatpush.msra.mxu2 %v5440_v53  ;;  %v5575_v43 = vsub.f32 %v400_v51, %v5553_v46  ;;  %v2945_v45 = vand.u32 4294901760, %v5564_v4 }
 0x191   : > { %2792 = vmatpush.msra.mxu1 %v5191_v3  ;;  %2900 = vmatpush.msra.mxu3 %v2899_v21  ;;  %v2917_v3 = vand.u32 4294901760, %v2916_v12  ;;  %v2928_v21 = vsub.f32 %v5520_v15, %v2927_v17  ;;  %v5966_v12 = vand.u32 4294901760, %v5332_v44  ;;  %v5968_v44 = vand.u32 4294901760, %v5370_v23 }
 0x192   : > { %2755 = vmatpush.msra.mxu0 %v5963_v59  ;;  %2835 = vmatpush.msra.mxu2 %v5455_v27  ;;  %v5970_v23 = vand.u32 4294901760, %v5363_v34 }
 0x193   : > { %2794 = vmatpush.msra.mxu1 %v5213_v39  ;;  %2906 = vmatpush.msra.mxu3 %v2905_v1  ;;  %v2923_v39 = vand.u32 4294901760, %v2922_v30  ;;  %v5965_v1 = vand.u32 4294901760, %v5318_v16  ;;  %v2929_v51 = vand.u32 4294901760, %v2928_v21  ;;  %v2951_v16 = vand.u32 4294901760, %v5575_v43 }
 0x194   : > { %2759 = vmatpush.msra.mxu0 %v5964_v6  ;;  %2837 = vmatpush.msra.mxu2 %v5469_v61  ;;  %v5967_v30 = vand.u32 4294901760, %v5349_v22  ;;  %v5973_v21 = vand.u32 4294901760, %v5385_v49 }
 0x195   : > { %2796 = vmatpush.msra.mxu1 %v5227_v18  ;;  %2912 = vmatpush.msra.mxu3 %v2911_v8  ;;  %v2940_v18 = vsub.f32 %v5551_v42, %v2939_v31  ;;  %v2935_v8 = vand.u32 4294901760, %v2934_v52  ;;  %v2952_v22 = vsub.f32 %v5575_v43, %v2951_v16 }
 0x196   : > { %2763 = vmatpush.msra.mxu0 %v5965_v1  ;;  %2839 = vmatpush.msra.mxu2 %v5482_v9 }
 0x197   : > { %2798 = vmatpush.msra.mxu1 %v5239_v7  ;;  %2918 = vmatpush.msra.mxu3 %v2917_v3  ;;  %v2946_v7 = vsub.f32 %v5564_v4, %v2945_v45  ;;  %v5971_v3 = vld [vmem:[#allocation11_spill] sm:$0xff] }
 0x198   : > { %2767 = vmatpush.msra.mxu0 %v5966_v12  ;;  %2841 = vmatpush.msra.mxu2 %v5495_v28 }
 0x199   : > { %2800 = vmatpush.msra.mxu1 %v5253_v38  ;;  %2924 = vmatpush.msra.mxu3 %v2923_v39  ;;  %v2941_v38 = vand.u32 4294901760, %v2940_v18  ;;  %v2947_v59 = vand.u32 4294901760, %v2946_v7 }
 0x19a   : > { %2771 = vmatpush.msra.mxu0 %v5967_v30  ;;  %2843 = vmatpush.msra.mxu2 %v5508_v24  ;;  %v302_v30 = vld [vmem:[#allocation2 + $0x8] sm:$0xff] }
 0x19b   : > { %2802 = vmatpush.msra.mxu1 %v5265_v25  ;;  %2930 = vmatpush.msra.mxu3 %v2929_v51  ;;  %v2953_v25 = vand.u32 4294901760, %v2952_v22 }
 0x19c   : > { %2775 = vmatpush.msra.mxu0 %v5968_v44  ;;  %2845 = vmatpush.msra.mxu2 %v5526_v48 }
 0x19d   : > { %2804 = vmatpush.msra.mxu1 %v5278_v33  ;;  %2936 = vmatpush.msra.mxu3 %v2935_v8  ;;  %v5969_v33 = vld [vmem:[#allocation21_spill] sm:$0xff] }
 0x19e   : > { %2777 = vmatmul.f32.vlgmr.msra.gmra.mxu0 %v5957_v26  ;;  %2847 = vmatpush.msra.mxu2 %v5540_v29 }
 0x19f   : > { %2962 = vmatpush.msrb.mxu0 %v5363_v34  ;;  %2806 = vmatpush.msra.mxu1 %v5291_v11  ;;  %v5972_v11 = vld [vmem:[#allocation18_spill] sm:$0xff] }
 0x1a0   : > { %2942 = vmatpush.msra.mxu3 %v2941_v38  ;;  %2849 = vmatpush.msra.mxu2 %v5553_v46 }
 0x1a1   : > { %2965 = vmatpush.msrb.mxu0 %v5385_v49  ;;  %2808 = vmatpush.msra.mxu1 %v5303_v47  ;;  %v5974_v47 = vand.u32 4294901760, %v5396_v36  ;;  %v5975_v49 = vand.u32 4294901760, %v5404_v10 }
 0x1a2   : > { %2948 = vmatpush.msra.mxu3 %v2947_v59  ;;  %2855 = vmatmul.f32.vlgmr.msra.gmra.mxu2 %v5969_v33 }
 0x1a3   : > { %2968 = vmatpush.msrb.mxu0 %v5396_v36  ;;  %3056 = vmatpush.msrb.mxu2 %v5970_v23 }
 0x1a4   : > { %2810 = vmatpush.msra.mxu1 %v5971_v3  ;;  %2954 = vmatpush.msra.mxu3 %v2953_v25 }
 0x1a5   : > { %2956 = vmatmul.f32.vlgmr.msra.gmra.mxu3 %v5972_v11  ;;  %2971 = vmatpush.msrb.mxu0 %v5404_v10 }
 0x1a6   : > { %3060 = vmatpush.msrb.mxu2 %v5973_v21  ;;  %3123 = vmatpush.msrb.mxu3 %v5336_v58 }
 0x1a7   : > { %2812 = vmatpush.msra.mxu1 %v5343_v63  ;;  %2974 = vmatpush.msrb.mxu0 %v5417_v32  ;;  %v5977_v63 = vand.u32 4294901760, %v5453_v19 }
 0x1a8   : > { %2814 = vmatmul.f32.vlgmr.msra.gmra.mxu1 %v5957_v26  ;;  %3064 = vmatpush.msrb.mxu2 %v5974_v47 }
 0x1a9   : > { %3015 = vmatpush.msrb.mxu1 %v5336_v58  ;;  %3125 = vmatpush.msrb.mxu3 %v5357_v37  ;;  %v5976_v58 = vand.u32 4294901760, %v5438_v2 }
 0x1aa   : > { %2977 = vmatpush.msrb.mxu0 %v5438_v2  ;;  %3068 = vmatpush.msrb.mxu2 %v5975_v49 }
 0x1ab   : > { %3017 = vmatpush.msrb.mxu1 %v5357_v37  ;;  %3127 = vmatpush.msrb.mxu3 %v5372_v40  ;;  %v5978_v37 = vand.u32 4294901760, %v5467_v60 }
 0x1ac   : > { %2980 = vmatpush.msrb.mxu0 %v5453_v19  ;;  %3072 = vmatpush.msrb.mxu2 %v2885_v13 }
 0x1ad   : > { %3019 = vmatpush.msrb.mxu1 %v5372_v40  ;;  %3129 = vmatpush.msrb.mxu3 %v5378_v20 }
 0x1ae   : > { %2983 = vmatpush.msrb.mxu0 %v5467_v60  ;;  %3076 = vmatpush.msrb.mxu2 %v5976_v58 }
 0x1af   : > { %3021 = vmatpush.msrb.mxu1 %v5378_v20  ;;  %3131 = vmatpush.msrb.mxu3 %v5390_v35 }
 0x1b0   : > { %2986 = vmatpush.msrb.mxu0 %v5480_v41  ;;  %3080 = vmatpush.msrb.mxu2 %v5977_v63 }
 0x1b1   : > { %3023 = vmatpush.msrb.mxu1 %v5390_v35  ;;  %3133 = vmatpush.msrb.mxu3 %v5409_v62 }
 0x1b2   : > { %2989 = vmatpush.msrb.mxu0 %v5493_v50  ;;  %3084 = vmatpush.msrb.mxu2 %v5978_v37 }
 0x1b3   : > { %3025 = vmatpush.msrb.mxu1 %v5409_v62  ;;  %3135 = vmatpush.msrb.mxu3 %v5426_v5  ;;  %v5980_v62 = vld [vmem:[#allocation20_spill] sm:$0xff]  ;;  %v1833_v2 = vpop.f32.mrf.mxu0 }
 0x1b4   : > { %2992 = vmatpush.msrb.mxu0 %v5506_v54  ;;  %3088 = vmatpush.msrb.mxu2 %v2909_v0 }
 0x1b5   : > { %3027 = vmatpush.msrb.mxu1 %v5426_v5  ;;  %3137 = vmatpush.msrb.mxu3 %v5440_v53  ;;  %v5979_v5 = vld [vmem:[#allocation19_spill] sm:$0xff] }
 0x1b6   : > { %2995 = vmatpush.msrb.mxu0 %v5520_v15  ;;  %3092 = vmatpush.msrb.mxu2 %v2915_v57 }
 0x1b7   : > { %3029 = vmatpush.msrb.mxu1 %v5440_v53  ;;  %3139 = vmatpush.msrb.mxu3 %v5455_v27 }
 0x1b8   : > { %2998 = vmatpush.msrb.mxu0 %v5534_v14  ;;  %3096 = vmatpush.msrb.mxu2 %v2921_v55 }
 0x1b9   : > { %3031 = vmatpush.msrb.mxu1 %v5455_v27  ;;  %3141 = vmatpush.msrb.mxu3 %v5469_v61 }
 0x1ba   : > { %3001 = vmatpush.msrb.mxu0 %v5551_v42  ;;  %3100 = vmatpush.msrb.mxu2 %v2927_v17  ;;  %v1934_v27 = vpop.f32.mrf.mxu1 }
 0x1bb   : > { %3033 = vmatpush.msrb.mxu1 %v5469_v61  ;;  %3143 = vmatpush.msrb.mxu3 %v5482_v9  ;;  %v1935_v34 = vadd.f32 %v1934_v27, %v1833_v2  ;;  %v1988_v40 = vpop.f32.mrf.mxu2 }
 0x1bc   : > { %3004 = vmatpush.msrb.mxu0 %v5564_v4  ;;  %3104 = vmatpush.msrb.mxu2 %v2933_v56 }
 0x1bd   : > { %3035 = vmatpush.msrb.mxu1 %v5482_v9  ;;  %3145 = vmatpush.msrb.mxu3 %v5495_v28  ;;  %v1989_v53 = vadd.f32 %v1988_v40, %v1935_v34 }
 0x1be   : > { %3007 = vmatpush.msrb.mxu0 %v5575_v43  ;;  %3108 = vmatpush.msrb.mxu2 %v2939_v31  ;;  %v2027_v20 = vpop.f32.mrf.mxu3 }
 0x1bf   : > { %3037 = vmatpush.msrb.mxu1 %v5495_v28  ;;  %3147 = vmatpush.msrb.mxu3 %v5508_v24  ;;  %v2028_v35 = vadd.f32 %v2027_v20, %v1989_v53 }
 0x1c0   : > { %3010 = vmatmul.f32.vlgmr.msrb.gmra.mxu0 %v5979_v5  ;;  %3112 = vmatpush.msrb.mxu2 %v2945_v45 }
 0x1c1   : > { %3039 = vmatpush.msrb.mxu1 %v5508_v24  ;;  %3149 = vmatpush.msrb.mxu3 %v5526_v48  ;;  %v2096_v36 = vpop.f32.mrf.mxu0 }
 0x1c2   : > { %3116 = vmatpush.msrb.mxu2 %v2951_v16  ;;  %v2097_v10 = vadd.f32 %v2096_v36, %v2028_v35 }
 0x1c3   : > { %3041 = vmatpush.msrb.mxu1 %v5526_v48  ;;  %3151 = vmatpush.msrb.mxu3 %v5540_v29 }
 0x1c4   : > { %3118 = vmatmul.f32.vlgmr.msrb.gmra.mxu2 %v5972_v11  ;;  %v2133_v32 = vpop.f32.mrf.mxu1 }
 0x1c5   : > { %3043 = vmatpush.msrb.mxu1 %v5540_v29  ;;  %3153 = vmatpush.msrb.mxu3 %v5553_v46  ;;  %v2134_v19 = vadd.f32 %v2133_v32, %v2097_v10  ;;  %v2174_v13 = vpop.f32.mrf.mxu2 }
 0x1c6   : > { %3155 = vmatmul.f32.vlgmr.msrb.gmra.mxu3 %v5972_v11 }
 0x1c7   : > { %3045 = vmatpush.msrb.mxu1 %v5553_v46  ;;  %v2175_v24 = vadd.f32 %v2174_v13, %v2134_v19 }
 0x1c8   : > { %3049 = vmatmul.f32.vlgmr.msrb.gmra.mxu1 %v5980_v62  ;;  %v2275_v60 = vpop.f32.mrf.mxu3 }
 0x1c9   : > { %v2276_v41 = vadd.f32 %v2275_v60, %v2175_v24 }
 0x1d7   : > { %v2329_v61 = vpop.f32.mrf.mxu0 }
 0x1d8   : > { %v2330_v26 = vadd.f32 %v2329_v61, %v2276_v41 }
 0x1e1   : > { %v2368_v9 = vpop.f32.mrf.mxu1  ;;  %v2437_v28 = vpop.f32.mrf.mxu2 }
 0x1e2   : > { %v2369_v50 = vadd.f32 %v2368_v9, %v2330_v26 }
 0x1e4   : > { %v2438_v0 = vadd.f32 %v2437_v28, %v2369_v50  ;;  %v2474_v54 = vpop.f32.mrf.mxu3 }
 0x1e6   : > { %v2475_v15 = vadd.f32 %v2474_v54, %v2438_v0 }
 0x1f9   : > { %v2515_v57 = vpop.f32.mrf.mxu0 }
 0x1fa   : > { %v2516_v55 = vadd.f32 %v2515_v57, %v2475_v15 }
 0x203   : > { %v2616_v48 = vpop.f32.mrf.mxu1  ;;  %v2670_v29 = vpop.f32.mrf.mxu2 }
 0x204   : > { %v2617_v14 = vadd.f32 %v2616_v48, %v2516_v55 }
 0x206   : > { %v2671_v17 = vadd.f32 %v2670_v29, %v2617_v14  ;;  %v2709_v42 = vpop.f32.mrf.mxu3 }
 0x208   : > { %v2710_v56 = vadd.f32 %v2709_v42, %v2671_v17 }
 0x21b   : > { %v2778_v46 = vpop.f32.mrf.mxu0 }
 0x21c   : > { %v2779_v6 = vadd.f32 %v2778_v46, %v2710_v56 }
 0x225   : > { %v2815_v4 = vpop.f32.mrf.mxu1  ;;  %v2856_v43 = vpop.f32.mrf.mxu2 }
 0x226   : > { %v2816_v31 = vadd.f32 %v2815_v4, %v2779_v6 }
 0x228   : > { %v2857_v39 = vadd.f32 %v2856_v43, %v2816_v31  ;;  %v2957_v52 = vpop.f32.mrf.mxu3 }
 0x22a   : > { %v2958_v45 = vadd.f32 %v2957_v52, %v2857_v39 }
 0x23d   : > { %v3011_v1 = vpop.f32.mrf.mxu0 }
 0x23e   : > { %v3012_v51 = vadd.f32 %v3011_v1, %v2958_v45 }
 0x245   : > { %v3050_v12 = vpop.f32.mrf.mxu1 }
 0x246   : > { %v3051_v18 = vadd.f32 %v3050_v12, %v3012_v51 }
 0x247   : > { %v3119_v16 = vpop.f32.mrf.mxu2 }
 0x248   : > { %v3120_v8 = vadd.f32 %v3119_v16, %v3051_v18 }
 0x249   : > { %v3156_v7 = vpop.f32.mrf.mxu3 }
 0x24a   : > { %v3157_v44 = vadd.f32 %v3156_v7, %v3120_v8  ;;  %3166 = sbr.rel (%p3309_p1) target bundleno = 599 (0x257), region = 44 }
 0x24c   : > { %v3160_v38 = vadd.f32 %v3157_v44, %v302_v30 }
 0x24e   : > { %3162 = vst [vmem:[#allocation2 + $0x8] sm:$0xff] %v3160_v38 }
 0x24f   : > { %v3167_v22 = vld [vmem:[#allocation2] sm:$0xff] }
 0x250   : > { %3169 = vst [vmem:[%s5730_s3] sm:$0xff] %v3167_v22 }
 0x255   : > { %v3168_v59 = vld [vmem:[#allocation2 + $0x8] sm:$0xff] }
 0x256   : > { %3170 = vst [vmem:[%s5730_s3 + $0x8] sm:$0xff] %v3168_v59 }
 0x257 PF: > { %s16_s17 = sadd.s32 1, %s3453_s17   ;;  %s5981_s12 = smov %s3437_s13 }
 0x258   : > { %p13_p2 = scmp.ge.s32.totalorder %s16_s17, 4   ;;  %s5982_s13 = smov %s3441_s14 }
 0x259   : > { %s5983_s14 = smov %s3526_s24  ;;  %s5984_s15 = smov %s3449_s16 }
 0x25a   : > { %s5985_s16 = smov %s5987_s19  ;;  %15 = sbr.rel (!%p13_p2) target bundleno = 4 (0x4), region = 86 }
 0x25f   :  { %3201 = vsyncpa [#allocation4], 1 }
 0x260   :  { %3203 = vsyncpa [#allocation4 + $0x1], 1 }

</bundles_post_ra>
